<compile_context>
chip_gen: v5e
topology: v5e:2x2
jax: 0.10.0
libtpu: 0.0.40
codegen_flags: <defaults>
</compile_context>

<pallas_src>
import jax
import jax.numpy as jnp
from jax.experimental import pallas as pl
from jax.experimental.pallas import tpu as pltpu


def lstm_dqn_kernel(x_ref, wih_ref, whh_ref, b_ref, wfc_ref, bfc_ref,
                    h0_ref, c0_ref, q_ref, hN_ref, cN_ref, xg_sc):
    """Whole sequence in one invocation; x_ref is time-major (T, Bb, Dp)."""
    T, Bb, Dp = x_ref.shape
    Hp = hN_ref.shape[1]
    G = 4 * Hp

    # ---- Hoisted out of the recurrence: input projection for ALL timesteps
    # as one (T*Bb, Dp) x (Dp, 4Hp) MXU matmul + a single bias broadcast.
    # (T, Bb, Dp) -> (T*Bb, Dp) is layout-preserving (Bb is a multiple of 8).
    x_all = x_ref[...].reshape(T * Bb, Dp)
    xg = jnp.dot(x_all, wih_ref[...], preferred_element_type=jnp.float32)
    xg_sc[...] = (xg + b_ref[...]).reshape(T, Bb, G)

    whh = whh_ref[...]  # (Hp, 4Hp), loaded once

    def step(t, carry):
        h, c = carry
        # Only the h @ W_hh matmul remains inside the serial recurrence.
        gates = xg_sc[t] + jnp.dot(h, whh, preferred_element_type=jnp.float32)
        # PyTorch LSTM gate order (i, f, g, o); Hp is a multiple of 128, so
        # every slice is lane-aligned (no XLU relayout).
        i_g = jax.nn.sigmoid(gates[:, 0 * Hp:1 * Hp])
        f_g = jax.nn.sigmoid(gates[:, 1 * Hp:2 * Hp])
        g_g = jnp.tanh(gates[:, 2 * Hp:3 * Hp])
        o_g = jax.nn.sigmoid(gates[:, 3 * Hp:4 * Hp])
        c_new = f_g * c + i_g * g_g
        h_new = o_g * jnp.tanh(c_new)
        return h_new, c_new

    # T is small/static here -> fully unroll for LLO scheduler visibility.
    h_n, c_n = jax.lax.fori_loop(
        0, T, step, (h0_ref[...], c0_ref[...]), unroll=True)

    # ---- Epilogue runs exactly once (not per timestep): final states + fc.
    hN_ref[...] = h_n.astype(hN_ref.dtype)
    cN_ref[...] = c_n.astype(cN_ref.dtype)
    q_ref[...] = (jnp.dot(h_n, wfc_ref[...], preferred_element_type=jnp.float32)
                  + bfc_ref[...]).astype(q_ref.dtype)


def _round_up(n, m):
    return ((n + m - 1) // m) * m


def rnn_dqn_forward(x, params, hidden=None):
    """x: (B, T, D) float32.  Returns (q_values (B, A), (h_n, c_n)) like PyTorch."""
    B, T, D = x.shape
    H = params["w_hh"].shape[0]          # w_hh stored transposed: (H, 4H)
    A = params["w_fc"].shape[1]          # w_fc stored transposed: (H, A)
    f32 = jnp.float32

    # vreg-friendly padded sizes: lanes -> multiple of 128, batch -> mult of 8.
    Bp = _round_up(B, 8)
    Dp = _round_up(D, 128)
    Hp = _round_up(H, 128)
    Ap = _round_up(A, 128)
    G = 4 * Hp

    # Per-gate zero padding so each gate owns a 128-aligned slab of the 4Hp axis.
    wih = jnp.pad(params["w_ih"].reshape(D, 4, H).astype(f32),
                  ((0, Dp - D), (0, 0), (0, Hp - H))).reshape(Dp, G)
    whh = jnp.pad(params["w_hh"].reshape(H, 4, H).astype(f32),
                  ((0, Hp - H), (0, 0), (0, Hp - H))).reshape(Hp, G)
    b = jnp.pad((params["b_ih"] + params["b_hh"]).reshape(4, H).astype(f32),
                ((0, 0), (0, Hp - H))).reshape(1, G)
    wfc = jnp.pad(params["w_fc"].astype(f32), ((0, Hp - H), (0, Ap - A)))
    bfc = jnp.pad(params["b_fc"].astype(f32), (0, Ap - A)).reshape(1, Ap)

    # time-major, padded input: (T, Bp, Dp)
    x_p = jnp.pad(jnp.transpose(x.astype(f32), (1, 0, 2)),
                  ((0, 0), (0, Bp - B), (0, Dp - D)))

    if hidden is None:
        h0 = jnp.zeros((Bp, Hp), f32)
        c0 = jnp.zeros((Bp, Hp), f32)
    else:  # PyTorch-style hidden = (h0 (1,B,H), c0 (1,B,H))
        h0 = jnp.pad(hidden[0][0].astype(f32), ((0, Bp - B), (0, Hp - H)))
        c0 = jnp.pad(hidden[1][0].astype(f32), ((0, Bp - B), (0, Hp - H)))

    # Batch is embarrassingly parallel -> grid over batch blocks ("parallel",
    # so v7x can shard it across its two TensorCores). One block at demo size.
    Bb = Bp
    nB = Bp // Bb

    grid_spec = pltpu.PrefetchScalarGridSpec(
        num_scalar_prefetch=0,
        grid=(nB,),
        in_specs=[
            pl.BlockSpec((T, Bb, Dp), lambda i: (0, i, 0)),   # x (time-major)
            pl.BlockSpec((Dp, G), lambda i: (0, 0)),          # W_ih^T (padded)
            pl.BlockSpec((Hp, G), lambda i: (0, 0)),          # W_hh^T (padded)
            pl.BlockSpec((1, G), lambda i: (0, 0)),           # b_ih + b_hh
            pl.BlockSpec((Hp, Ap), lambda i: (0, 0)),         # W_fc^T (padded)
            pl.BlockSpec((1, Ap), lambda i: (0, 0)),          # b_fc
            pl.BlockSpec((Bb, Hp), lambda i: (i, 0)),         # h0
            pl.BlockSpec((Bb, Hp), lambda i: (i, 0)),         # c0
        ],
        out_specs=[
            pl.BlockSpec((Bb, Ap), lambda i: (i, 0)),         # q_values
            pl.BlockSpec((Bb, Hp), lambda i: (i, 0)),         # h_n
            pl.BlockSpec((Bb, Hp), lambda i: (i, 0)),         # c_n
        ],
        scratch_shapes=[pltpu.VMEM((T, Bb, G), jnp.float32)],  # x @ W_ih + b
    )

    q_p, h_p, c_p = pl.pallas_call(
        lstm_dqn_kernel,
        out_shape=(
            jax.ShapeDtypeStruct((Bp, Ap), f32),
            jax.ShapeDtypeStruct((Bp, Hp), f32),
            jax.ShapeDtypeStruct((Bp, Hp), f32),
        ),
        grid_spec=grid_spec,
        compiler_params=pltpu.CompilerParams(
            dimension_semantics=("parallel",)),
    )(x_p, wih, whh, b, wfc, bfc, h0, c0)

    q = q_p[:B, :A]
    h_n = h_p[:B, :H]
    c_n = c_p[:B, :H]
    # PyTorch nn.LSTM returns hidden as (num_layers, B, H); num_layers=1 here.
    return q, (h_n[None, :, :], c_n[None, :, :])


def init_params(key, input_dim, hidden_dim, n_actions):
    """Deterministic init matching PyTorch shapes; weights stored transposed."""
    k = jax.random.split(key, 6)
    s = 1.0 / jnp.sqrt(hidden_dim)
    u = lambda kk, shape: jax.random.uniform(kk, shape, jnp.float32, -s, s)
    return {
        "w_ih": u(k[0], (input_dim, 4 * hidden_dim)),   # = weight_ih_l0.T
        "w_hh": u(k[1], (hidden_dim, 4 * hidden_dim)),  # = weight_hh_l0.T
        "b_ih": u(k[2], (4 * hidden_dim,)),
        "b_hh": u(k[3], (4 * hidden_dim,)),
        "w_fc": u(k[4], (hidden_dim, n_actions)),       # = fc.weight.T
        "b_fc": u(k[5], (n_actions,)),
    }


def reference_forward(x, params):
    """Pure-JAX reference of the PyTorch LSTM + fc for validation."""
    B, T, D = x.shape
    H = params["w_hh"].shape[0]
    b = params["b_ih"] + params["b_hh"]

    def step(carry, x_t):
        h, c = carry
        g = x_t @ params["w_ih"] + h @ params["w_hh"] + b
        i = jax.nn.sigmoid(g[:, 0 * H:1 * H])
        f = jax.nn.sigmoid(g[:, 1 * H:2 * H])
        gg = jnp.tanh(g[:, 2 * H:3 * H])
        o = jax.nn.sigmoid(g[:, 3 * H:4 * H])
        c_n = f * c + i * gg
        h_n = o * jnp.tanh(c_n)
        return (h_n, c_n), None

    h0 = jnp.zeros((B, H), jnp.float32)
    c0 = jnp.zeros((B, H), jnp.float32)
    (h_n, c_n), _ = jax.lax.scan(step, (h0, c0), jnp.transpose(x, (1, 0, 2)))
    q = h_n @ params["w_fc"] + params["b_fc"]
    return q, (h_n[None], c_n[None])


if __name__ == "__main__":
    B, T, D, H, A = 2, 8, 16, 32, 5
    key = jax.random.PRNGKey(0)
    kx, kp = jax.random.split(key)
    x = jax.random.normal(kx, (B, T, D), jnp.float32)
    params = init_params(kp, D, H, A)

    fwd = jax.jit(rnn_dqn_forward)
    q, (h_n, c_n) = fwd(x, params)
    jax.block_until_ready((q, h_n, c_n))

    q_ref, (h_ref, c_ref) = reference_forward(x, params)
    assert jnp.allclose(q, q_ref, atol=1e-5, rtol=1e-5)
    assert jnp.allclose(h_n, h_ref, atol=1e-5, rtol=1e-5)
    assert jnp.allclose(c_n, c_ref, atol=1e-5, rtol=1e-5)

    print("KERNEL_OK")
</pallas_src>

<mosaic_0001>
module attributes {stable_mosaic.version = 11 : i64} {
  func.func @lstm_dqn_kernel(%arg0: i32, %arg1: memref<8x8x128xf32, #tpu.memory_space<vmem>>, %arg2: memref<128x512xf32, #tpu.memory_space<vmem>>, %arg3: memref<128x512xf32, #tpu.memory_space<vmem>>, %arg4: memref<1x512xf32, #tpu.memory_space<vmem>>, %arg5: memref<128x128xf32, #tpu.memory_space<vmem>>, %arg6: memref<1x128xf32, #tpu.memory_space<vmem>>, %arg7: memref<8x128xf32, #tpu.memory_space<vmem>>, %arg8: memref<8x128xf32, #tpu.memory_space<vmem>>, %arg9: memref<8x128xf32, #tpu.memory_space<vmem>>, %arg10: memref<8x128xf32, #tpu.memory_space<vmem>>, %arg11: memref<8x128xf32, #tpu.memory_space<vmem>>, %arg12: memref<8x8x512xf32, #tpu.memory_space<vmem>>) attributes {dimension_semantics = [#tpu.dimension_semantics<parallel>], iteration_bounds = array<i64: 1>, scalar_prefetch = 0 : i64, scratch_operands = 1 : i64, tpu.core_type = #tpu.core_type<tc>, window_params = [{transform_indices = @transform_0, window_bounds = array<i64: 8, 8, 128>}, {pipeline_mode = #tpu.pipeline_mode<synchronous>, transform_indices = @transform_1, window_bounds = array<i64: 128, 512>}, {pipeline_mode = #tpu.pipeline_mode<synchronous>, transform_indices = @transform_2, window_bounds = array<i64: 128, 512>}, {pipeline_mode = #tpu.pipeline_mode<synchronous>, transform_indices = @transform_3, window_bounds = array<i64: 1, 512>}, {pipeline_mode = #tpu.pipeline_mode<synchronous>, transform_indices = @transform_4, window_bounds = array<i64: 128, 128>}, {pipeline_mode = #tpu.pipeline_mode<synchronous>, transform_indices = @transform_5, window_bounds = array<i64: 1, 128>}, {transform_indices = @transform_6, window_bounds = array<i64: 8, 128>}, {transform_indices = @transform_7, window_bounds = array<i64: 8, 128>}, {transform_indices = @transform_8, window_bounds = array<i64: 8, 128>}, {transform_indices = @transform_9, window_bounds = array<i64: 8, 128>}, {transform_indices = @transform_10, window_bounds = array<i64: 8, 128>}]} {
    %c0 = arith.constant 0 : index
    %c0_0 = arith.constant 0 : index
    %c0_1 = arith.constant 0 : index
    %0 = vector.load %arg1[%c0, %c0_0, %c0_1] : memref<8x8x128xf32, #tpu.memory_space<vmem>>, vector<8x8x128xf32>
    %1 = vector.shape_cast %0 : vector<8x8x128xf32> to vector<64x128xf32>
    %c0_2 = arith.constant 0 : index
    %c0_3 = arith.constant 0 : index
    %2 = vector.load %arg2[%c0_2, %c0_3] : memref<128x512xf32, #tpu.memory_space<vmem>>, vector<128x512xf32>
    %cst = arith.constant dense<0.000000e+00> : vector<64x512xf32>
    %3 = tpu.matmul %1, %2, %cst {dimension_numbers = #tpu.dot_dimension_numbers<[1], [0], [0], [1], [0, 0, 1, 1], [], []>} : vector<64x128xf32>, vector<128x512xf32>, vector<64x512xf32> -> vector<64x512xf32>
    %c0_4 = arith.constant 0 : index
    %c0_5 = arith.constant 0 : index
    %4 = vector.load %arg4[%c0_4, %c0_5] : memref<1x512xf32, #tpu.memory_space<vmem>>, vector<1x512xf32>
    %5 = vector.broadcast %4 : vector<1x512xf32> to vector<64x512xf32>
    %6 = arith.addf %3, %5 : vector<64x512xf32>
    %7 = vector.shape_cast %6 : vector<64x512xf32> to vector<8x8x512xf32>
    %c0_6 = arith.constant 0 : index
    %c0_7 = arith.constant 0 : index
    %c0_8 = arith.constant 0 : index
    %8 = vector.load %arg12[%c0_6, %c0_7, %c0_8] : memref<8x8x512xf32, #tpu.memory_space<vmem>>, vector<8x8x512xf32>
    tpu.vector_store %arg12[%c0_6, %c0_7, %c0_8], %7 {strides = array<i32>} : memref<8x8x512xf32, #tpu.memory_space<vmem>>, vector<8x8x512xf32>,
    %c0_9 = arith.constant 0 : index
    %c0_10 = arith.constant 0 : index
    %9 = vector.load %arg3[%c0_9, %c0_10] : memref<128x512xf32, #tpu.memory_space<vmem>>, vector<128x512xf32>
    %c0_11 = arith.constant 0 : index
    %c0_12 = arith.constant 0 : index
    %10 = vector.load %arg7[%c0_11, %c0_12] : memref<8x128xf32, #tpu.memory_space<vmem>>, vector<8x128xf32>
    %c0_13 = arith.constant 0 : index
    %c0_14 = arith.constant 0 : index
    %11 = vector.load %arg8[%c0_13, %c0_14] : memref<8x128xf32, #tpu.memory_space<vmem>>, vector<8x128xf32>
    %c0_i32 = arith.constant 0 : i32
    %12 = arith.index_cast %c0_i32 : i32 to index
    %c0_15 = arith.constant 0 : index
    %c0_16 = arith.constant 0 : index
    %13 = vector.load %arg12[%12, %c0_15, %c0_16] : memref<8x8x512xf32, #tpu.memory_space<vmem>>, vector<1x8x512xf32>
    %14 = vector.shape_cast %13 : vector<1x8x512xf32> to vector<8x512xf32>
    %cst_17 = arith.constant dense<0.000000e+00> : vector<8x512xf32>
    %15 = tpu.matmul %10, %9, %cst_17 {dimension_numbers = #tpu.dot_dimension_numbers<[1], [0], [0], [1], [0, 0, 1, 1], [], []>} : vector<8x128xf32>, vector<128x512xf32>, vector<8x512xf32> -> vector<8x512xf32>
    %16 = arith.addf %14, %15 : vector<8x512xf32>
    %17 = vector.extract_strided_slice %16 {offsets = [0, 0], sizes = [8, 128], strides = [1, 1]} : vector<8x512xf32> to vector<8x128xf32>
    %18 = arith.negf %17 : vector<8x128xf32>
    %19 = math.exp %18 : vector<8x128xf32>
    %cst_18 = arith.constant 1.000000e+00 : f32
    %20 = vector.broadcast %cst_18 : f32 to vector<8x128xf32>
    %21 = arith.addf %20, %19 : vector<8x128xf32>
    %22 = arith.divf %20, %21 : vector<8x128xf32>
    %23 = vector.extract_strided_slice %16 {offsets = [0, 128], sizes = [8, 128], strides = [1, 1]} : vector<8x512xf32> to vector<8x128xf32>
    %24 = arith.negf %23 : vector<8x128xf32>
    %25 = math.exp %24 : vector<8x128xf32>
    %cst_19 = arith.constant 1.000000e+00 : f32
    %26 = vector.broadcast %cst_19 : f32 to vector<8x128xf32>
    %27 = arith.addf %26, %25 : vector<8x128xf32>
    %28 = arith.divf %26, %27 : vector<8x128xf32>
    %29 = vector.extract_strided_slice %16 {offsets = [0, 256], sizes = [8, 128], strides = [1, 1]} : vector<8x512xf32> to vector<8x128xf32>
    %30 = math.tanh %29 : vector<8x128xf32>
    %31 = vector.extract_strided_slice %16 {offsets = [0, 384], sizes = [8, 128], strides = [1, 1]} : vector<8x512xf32> to vector<8x128xf32>
    %32 = arith.negf %31 : vector<8x128xf32>
    %33 = math.exp %32 : vector<8x128xf32>
    %cst_20 = arith.constant 1.000000e+00 : f32
    %34 = vector.broadcast %cst_20 : f32 to vector<8x128xf32>
    %35 = arith.addf %34, %33 : vector<8x128xf32>
    %36 = arith.divf %34, %35 : vector<8x128xf32>
    %37 = arith.mulf %28, %11 : vector<8x128xf32>
    %38 = arith.mulf %22, %30 : vector<8x128xf32>
    %39 = arith.addf %37, %38 : vector<8x128xf32>
    %40 = math.tanh %39 : vector<8x128xf32>
    %41 = arith.mulf %36, %40 : vector<8x128xf32>
    %c1_i32 = arith.constant 1 : i32
    %42 = arith.index_cast %c1_i32 : i32 to index
    %c0_21 = arith.constant 0 : index
    %c0_22 = arith.constant 0 : index
    %43 = vector.load %arg12[%42, %c0_21, %c0_22] : memref<8x8x512xf32, #tpu.memory_space<vmem>>, vector<1x8x512xf32>
    %44 = vector.shape_cast %43 : vector<1x8x512xf32> to vector<8x512xf32>
    %cst_23 = arith.constant dense<0.000000e+00> : vector<8x512xf32>
    %45 = tpu.matmul %41, %9, %cst_23 {dimension_numbers = #tpu.dot_dimension_numbers<[1], [0], [0], [1], [0, 0, 1, 1], [], []>} : vector<8x128xf32>, vector<128x512xf32>, vector<8x512xf32> -> vector<8x512xf32>
    %46 = arith.addf %44, %45 : vector<8x512xf32>
    %47 = vector.extract_strided_slice %46 {offsets = [0, 0], sizes = [8, 128], strides = [1, 1]} : vector<8x512xf32> to vector<8x128xf32>
    %48 = arith.negf %47 : vector<8x128xf32>
    %49 = math.exp %48 : vector<8x128xf32>
    %cst_24 = arith.constant 1.000000e+00 : f32
    %50 = vector.broadcast %cst_24 : f32 to vector<8x128xf32>
    %51 = arith.addf %50, %49 : vector<8x128xf32>
    %52 = arith.divf %50, %51 : vector<8x128xf32>
    %53 = vector.extract_strided_slice %46 {offsets = [0, 128], sizes = [8, 128], strides = [1, 1]} : vector<8x512xf32> to vector<8x128xf32>
    %54 = arith.negf %53 : vector<8x128xf32>
    %55 = math.exp %54 : vector<8x128xf32>
    %cst_25 = arith.constant 1.000000e+00 : f32
    %56 = vector.broadcast %cst_25 : f32 to vector<8x128xf32>
    %57 = arith.addf %56, %55 : vector<8x128xf32>
    %58 = arith.divf %56, %57 : vector<8x128xf32>
    %59 = vector.extract_strided_slice %46 {offsets = [0, 256], sizes = [8, 128], strides = [1, 1]} : vector<8x512xf32> to vector<8x128xf32>
    %60 = math.tanh %59 : vector<8x128xf32>
    %61 = vector.extract_strided_slice %46 {offsets = [0, 384], sizes = [8, 128], strides = [1, 1]} : vector<8x512xf32> to vector<8x128xf32>
    %62 = arith.negf %61 : vector<8x128xf32>
    %63 = math.exp %62 : vector<8x128xf32>
    %cst_26 = arith.constant 1.000000e+00 : f32
    %64 = vector.broadcast %cst_26 : f32 to vector<8x128xf32>
    %65 = arith.addf %64, %63 : vector<8x128xf32>
    %66 = arith.divf %64, %65 : vector<8x128xf32>
    %67 = arith.mulf %58, %39 : vector<8x128xf32>
    %68 = arith.mulf %52, %60 : vector<8x128xf32>
    %69 = arith.addf %67, %68 : vector<8x128xf32>
    %70 = math.tanh %69 : vector<8x128xf32>
    %71 = arith.mulf %66, %70 : vector<8x128xf32>
    %c2_i32 = arith.constant 2 : i32
    %72 = arith.index_cast %c2_i32 : i32 to index
    %c0_27 = arith.constant 0 : index
    %c0_28 = arith.constant 0 : index
    %73 = vector.load %arg12[%72, %c0_27, %c0_28] : memref<8x8x512xf32, #tpu.memory_space<vmem>>, vector<1x8x512xf32>
    %74 = vector.shape_cast %73 : vector<1x8x512xf32> to vector<8x512xf32>
    %cst_29 = arith.constant dense<0.000000e+00> : vector<8x512xf32>
    %75 = tpu.matmul %71, %9, %cst_29 {dimension_numbers = #tpu.dot_dimension_numbers<[1], [0], [0], [1], [0, 0, 1, 1], [], []>} : vector<8x128xf32>, vector<128x512xf32>, vector<8x512xf32> -> vector<8x512xf32>
    %76 = arith.addf %74, %75 : vector<8x512xf32>
    %77 = vector.extract_strided_slice %76 {offsets = [0, 0], sizes = [8, 128], strides = [1, 1]} : vector<8x512xf32> to vector<8x128xf32>
    %78 = arith.negf %77 : vector<8x128xf32>
    %79 = math.exp %78 : vector<8x128xf32>
    %cst_30 = arith.constant 1.000000e+00 : f32
    %80 = vector.broadcast %cst_30 : f32 to vector<8x128xf32>
    %81 = arith.addf %80, %79 : vector<8x128xf32>
    %82 = arith.divf %80, %81 : vector<8x128xf32>
    %83 = vector.extract_strided_slice %76 {offsets = [0, 128], sizes = [8, 128], strides = [1, 1]} : vector<8x512xf32> to vector<8x128xf32>
    %84 = arith.negf %83 : vector<8x128xf32>
    %85 = math.exp %84 : vector<8x128xf32>
    %cst_31 = arith.constant 1.000000e+00 : f32
    %86 = vector.broadcast %cst_31 : f32 to vector<8x128xf32>
    %87 = arith.addf %86, %85 : vector<8x128xf32>
    %88 = arith.divf %86, %87 : vector<8x128xf32>
    %89 = vector.extract_strided_slice %76 {offsets = [0, 256], sizes = [8, 128], strides = [1, 1]} : vector<8x512xf32> to vector<8x128xf32>
    %90 = math.tanh %89 : vector<8x128xf32>
    %91 = vector.extract_strided_slice %76 {offsets = [0, 384], sizes = [8, 128], strides = [1, 1]} : vector<8x512xf32> to vector<8x128xf32>
    %92 = arith.negf %91 : vector<8x128xf32>
    %93 = math.exp %92 : vector<8x128xf32>
    %cst_32 = arith.constant 1.000000e+00 : f32
    %94 = vector.broadcast %cst_32 : f32 to vector<8x128xf32>
    %95 = arith.addf %94, %93 : vector<8x128xf32>
    %96 = arith.divf %94, %95 : vector<8x128xf32>
    %97 = arith.mulf %88, %69 : vector<8x128xf32>
    %98 = arith.mulf %82, %90 : vector<8x128xf32>
    %99 = arith.addf %97, %98 : vector<8x128xf32>
    %100 = math.tanh %99 : vector<8x128xf32>
    %101 = arith.mulf %96, %100 : vector<8x128xf32>
    %c3_i32 = arith.constant 3 : i32
    %102 = arith.index_cast %c3_i32 : i32 to index
    %c0_33 = arith.constant 0 : index
    %c0_34 = arith.constant 0 : index
    %103 = vector.load %arg12[%102, %c0_33, %c0_34] : memref<8x8x512xf32, #tpu.memory_space<vmem>>, vector<1x8x512xf32>
    %104 = vector.shape_cast %103 : vector<1x8x512xf32> to vector<8x512xf32>
    %cst_35 = arith.constant dense<0.000000e+00> : vector<8x512xf32>
    %105 = tpu.matmul %101, %9, %cst_35 {dimension_numbers = #tpu.dot_dimension_numbers<[1], [0], [0], [1], [0, 0, 1, 1], [], []>} : vector<8x128xf32>, vector<128x512xf32>, vector<8x512xf32> -> vector<8x512xf32>
    %106 = arith.addf %104, %105 : vector<8x512xf32>
    %107 = vector.extract_strided_slice %106 {offsets = [0, 0], sizes = [8, 128], strides = [1, 1]} : vector<8x512xf32> to vector<8x128xf32>
    %108 = arith.negf %107 : vector<8x128xf32>
    %109 = math.exp %108 : vector<8x128xf32>
    %cst_36 = arith.constant 1.000000e+00 : f32
    %110 = vector.broadcast %cst_36 : f32 to vector<8x128xf32>
    %111 = arith.addf %110, %109 : vector<8x128xf32>
    %112 = arith.divf %110, %111 : vector<8x128xf32>
    %113 = vector.extract_strided_slice %106 {offsets = [0, 128], sizes = [8, 128], strides = [1, 1]} : vector<8x512xf32> to vector<8x128xf32>
    %114 = arith.negf %113 : vector<8x128xf32>
    %115 = math.exp %114 : vector<8x128xf32>
    %cst_37 = arith.constant 1.000000e+00 : f32
    %116 = vector.broadcast %cst_37 : f32 to vector<8x128xf32>
    %117 = arith.addf %116, %115 : vector<8x128xf32>
    %118 = arith.divf %116, %117 : vector<8x128xf32>
    %119 = vector.extract_strided_slice %106 {offsets = [0, 256], sizes = [8, 128], strides = [1, 1]} : vector<8x512xf32> to vector<8x128xf32>
    %120 = math.tanh %119 : vector<8x128xf32>
    %121 = vector.extract_strided_slice %106 {offsets = [0, 384], sizes = [8, 128], strides = [1, 1]} : vector<8x512xf32> to vector<8x128xf32>
    %122 = arith.negf %121 : vector<8x128xf32>
    %123 = math.exp %122 : vector<8x128xf32>
    %cst_38 = arith.constant 1.000000e+00 : f32
    %124 = vector.broadcast %cst_38 : f32 to vector<8x128xf32>
    %125 = arith.addf %124, %123 : vector<8x128xf32>
    %126 = arith.divf %124, %125 : vector<8x128xf32>
    %127 = arith.mulf %118, %99 : vector<8x128xf32>
    %128 = arith.mulf %112, %120 : vector<8x128xf32>
    %129 = arith.addf %127, %128 : vector<8x128xf32>
    %130 = math.tanh %129 : vector<8x128xf32>
    %131 = arith.mulf %126, %130 : vector<8x128xf32>
    %c4_i32 = arith.constant 4 : i32
    %132 = arith.index_cast %c4_i32 : i32 to index
    %c0_39 = arith.constant 0 : index
    %c0_40 = arith.constant 0 : index
    %133 = vector.load %arg12[%132, %c0_39, %c0_40] : memref<8x8x512xf32, #tpu.memory_space<vmem>>, vector<1x8x512xf32>
    %134 = vector.shape_cast %133 : vector<1x8x512xf32> to vector<8x512xf32>
    %cst_41 = arith.constant dense<0.000000e+00> : vector<8x512xf32>
    %135 = tpu.matmul %131, %9, %cst_41 {dimension_numbers = #tpu.dot_dimension_numbers<[1], [0], [0], [1], [0, 0, 1, 1], [], []>} : vector<8x128xf32>, vector<128x512xf32>, vector<8x512xf32> -> vector<8x512xf32>
    %136 = arith.addf %134, %135 : vector<8x512xf32>
    %137 = vector.extract_strided_slice %136 {offsets = [0, 0], sizes = [8, 128], strides = [1, 1]} : vector<8x512xf32> to vector<8x128xf32>
    %138 = arith.negf %137 : vector<8x128xf32>
    %139 = math.exp %138 : vector<8x128xf32>
    %cst_42 = arith.constant 1.000000e+00 : f32
    %140 = vector.broadcast %cst_42 : f32 to vector<8x128xf32>
    %141 = arith.addf %140, %139 : vector<8x128xf32>
    %142 = arith.divf %140, %141 : vector<8x128xf32>
    %143 = vector.extract_strided_slice %136 {offsets = [0, 128], sizes = [8, 128], strides = [1, 1]} : vector<8x512xf32> to vector<8x128xf32>
    %144 = arith.negf %143 : vector<8x128xf32>
    %145 = math.exp %144 : vector<8x128xf32>
    %cst_43 = arith.constant 1.000000e+00 : f32
    %146 = vector.broadcast %cst_43 : f32 to vector<8x128xf32>
    %147 = arith.addf %146, %145 : vector<8x128xf32>
    %148 = arith.divf %146, %147 : vector<8x128xf32>
    %149 = vector.extract_strided_slice %136 {offsets = [0, 256], sizes = [8, 128], strides = [1, 1]} : vector<8x512xf32> to vector<8x128xf32>
    %150 = math.tanh %149 : vector<8x128xf32>
    %151 = vector.extract_strided_slice %136 {offsets = [0, 384], sizes = [8, 128], strides = [1, 1]} : vector<8x512xf32> to vector<8x128xf32>
    %152 = arith.negf %151 : vector<8x128xf32>
    %153 = math.exp %152 : vector<8x128xf32>
    %cst_44 = arith.constant 1.000000e+00 : f32
    %154 = vector.broadcast %cst_44 : f32 to vector<8x128xf32>
    %155 = arith.addf %154, %153 : vector<8x128xf32>
    %156 = arith.divf %154, %155 : vector<8x128xf32>
    %157 = arith.mulf %148, %129 : vector<8x128xf32>
    %158 = arith.mulf %142, %150 : vector<8x128xf32>
    %159 = arith.addf %157, %158 : vector<8x128xf32>
    %160 = math.tanh %159 : vector<8x128xf32>
    %161 = arith.mulf %156, %160 : vector<8x128xf32>
    %c5_i32 = arith.constant 5 : i32
    %162 = arith.index_cast %c5_i32 : i32 to index
    %c0_45 = arith.constant 0 : index
    %c0_46 = arith.constant 0 : index
    %163 = vector.load %arg12[%162, %c0_45, %c0_46] : memref<8x8x512xf32, #tpu.memory_space<vmem>>, vector<1x8x512xf32>
    %164 = vector.shape_cast %163 : vector<1x8x512xf32> to vector<8x512xf32>
    %cst_47 = arith.constant dense<0.000000e+00> : vector<8x512xf32>
    %165 = tpu.matmul %161, %9, %cst_47 {dimension_numbers = #tpu.dot_dimension_numbers<[1], [0], [0], [1], [0, 0, 1, 1], [], []>} : vector<8x128xf32>, vector<128x512xf32>, vector<8x512xf32> -> vector<8x512xf32>
    %166 = arith.addf %164, %165 : vector<8x512xf32>
    %167 = vector.extract_strided_slice %166 {offsets = [0, 0], sizes = [8, 128], strides = [1, 1]} : vector<8x512xf32> to vector<8x128xf32>
    %168 = arith.negf %167 : vector<8x128xf32>
    %169 = math.exp %168 : vector<8x128xf32>
    %cst_48 = arith.constant 1.000000e+00 : f32
    %170 = vector.broadcast %cst_48 : f32 to vector<8x128xf32>
    %171 = arith.addf %170, %169 : vector<8x128xf32>
    %172 = arith.divf %170, %171 : vector<8x128xf32>
    %173 = vector.extract_strided_slice %166 {offsets = [0, 128], sizes = [8, 128], strides = [1, 1]} : vector<8x512xf32> to vector<8x128xf32>
    %174 = arith.negf %173 : vector<8x128xf32>
    %175 = math.exp %174 : vector<8x128xf32>
    %cst_49 = arith.constant 1.000000e+00 : f32
    %176 = vector.broadcast %cst_49 : f32 to vector<8x128xf32>
    %177 = arith.addf %176, %175 : vector<8x128xf32>
    %178 = arith.divf %176, %177 : vector<8x128xf32>
    %179 = vector.extract_strided_slice %166 {offsets = [0, 256], sizes = [8, 128], strides = [1, 1]} : vector<8x512xf32> to vector<8x128xf32>
    %180 = math.tanh %179 : vector<8x128xf32>
    %181 = vector.extract_strided_slice %166 {offsets = [0, 384], sizes = [8, 128], strides = [1, 1]} : vector<8x512xf32> to vector<8x128xf32>
    %182 = arith.negf %181 : vector<8x128xf32>
    %183 = math.exp %182 : vector<8x128xf32>
    %cst_50 = arith.constant 1.000000e+00 : f32
    %184 = vector.broadcast %cst_50 : f32 to vector<8x128xf32>
    %185 = arith.addf %184, %183 : vector<8x128xf32>
    %186 = arith.divf %184, %185 : vector<8x128xf32>
    %187 = arith.mulf %178, %159 : vector<8x128xf32>
    %188 = arith.mulf %172, %180 : vector<8x128xf32>
    %189 = arith.addf %187, %188 : vector<8x128xf32>
    %190 = math.tanh %189 : vector<8x128xf32>
    %191 = arith.mulf %186, %190 : vector<8x128xf32>
    %c6_i32 = arith.constant 6 : i32
    %192 = arith.index_cast %c6_i32 : i32 to index
    %c0_51 = arith.constant 0 : index
    %c0_52 = arith.constant 0 : index
    %193 = vector.load %arg12[%192, %c0_51, %c0_52] : memref<8x8x512xf32, #tpu.memory_space<vmem>>, vector<1x8x512xf32>
    %194 = vector.shape_cast %193 : vector<1x8x512xf32> to vector<8x512xf32>
    %cst_53 = arith.constant dense<0.000000e+00> : vector<8x512xf32>
    %195 = tpu.matmul %191, %9, %cst_53 {dimension_numbers = #tpu.dot_dimension_numbers<[1], [0], [0], [1], [0, 0, 1, 1], [], []>} : vector<8x128xf32>, vector<128x512xf32>, vector<8x512xf32> -> vector<8x512xf32>
    %196 = arith.addf %194, %195 : vector<8x512xf32>
    %197 = vector.extract_strided_slice %196 {offsets = [0, 0], sizes = [8, 128], strides = [1, 1]} : vector<8x512xf32> to vector<8x128xf32>
    %198 = arith.negf %197 : vector<8x128xf32>
    %199 = math.exp %198 : vector<8x128xf32>
    %cst_54 = arith.constant 1.000000e+00 : f32
    %200 = vector.broadcast %cst_54 : f32 to vector<8x128xf32>
    %201 = arith.addf %200, %199 : vector<8x128xf32>
    %202 = arith.divf %200, %201 : vector<8x128xf32>
    %203 = vector.extract_strided_slice %196 {offsets = [0, 128], sizes = [8, 128], strides = [1, 1]} : vector<8x512xf32> to vector<8x128xf32>
    %204 = arith.negf %203 : vector<8x128xf32>
    %205 = math.exp %204 : vector<8x128xf32>
    %cst_55 = arith.constant 1.000000e+00 : f32
    %206 = vector.broadcast %cst_55 : f32 to vector<8x128xf32>
    %207 = arith.addf %206, %205 : vector<8x128xf32>
    %208 = arith.divf %206, %207 : vector<8x128xf32>
    %209 = vector.extract_strided_slice %196 {offsets = [0, 256], sizes = [8, 128], strides = [1, 1]} : vector<8x512xf32> to vector<8x128xf32>
    %210 = math.tanh %209 : vector<8x128xf32>
    %211 = vector.extract_strided_slice %196 {offsets = [0, 384], sizes = [8, 128], strides = [1, 1]} : vector<8x512xf32> to vector<8x128xf32>
    %212 = arith.negf %211 : vector<8x128xf32>
    %213 = math.exp %212 : vector<8x128xf32>
    %cst_56 = arith.constant 1.000000e+00 : f32
    %214 = vector.broadcast %cst_56 : f32 to vector<8x128xf32>
    %215 = arith.addf %214, %213 : vector<8x128xf32>
    %216 = arith.divf %214, %215 : vector<8x128xf32>
    %217 = arith.mulf %208, %189 : vector<8x128xf32>
    %218 = arith.mulf %202, %210 : vector<8x128xf32>
    %219 = arith.addf %217, %218 : vector<8x128xf32>
    %220 = math.tanh %219 : vector<8x128xf32>
    %221 = arith.mulf %216, %220 : vector<8x128xf32>
    %c7_i32 = arith.constant 7 : i32
    %222 = arith.index_cast %c7_i32 : i32 to index
    %c0_57 = arith.constant 0 : index
    %c0_58 = arith.constant 0 : index
    %223 = vector.load %arg12[%222, %c0_57, %c0_58] : memref<8x8x512xf32, #tpu.memory_space<vmem>>, vector<1x8x512xf32>
    %224 = vector.shape_cast %223 : vector<1x8x512xf32> to vector<8x512xf32>
    %cst_59 = arith.constant dense<0.000000e+00> : vector<8x512xf32>
    %225 = tpu.matmul %221, %9, %cst_59 {dimension_numbers = #tpu.dot_dimension_numbers<[1], [0], [0], [1], [0, 0, 1, 1], [], []>} : vector<8x128xf32>, vector<128x512xf32>, vector<8x512xf32> -> vector<8x512xf32>
    %226 = arith.addf %224, %225 : vector<8x512xf32>
    %227 = vector.extract_strided_slice %226 {offsets = [0, 0], sizes = [8, 128], strides = [1, 1]} : vector<8x512xf32> to vector<8x128xf32>
    %228 = arith.negf %227 : vector<8x128xf32>
    %229 = math.exp %228 : vector<8x128xf32>
    %cst_60 = arith.constant 1.000000e+00 : f32
    %230 = vector.broadcast %cst_60 : f32 to vector<8x128xf32>
    %231 = arith.addf %230, %229 : vector<8x128xf32>
    %232 = arith.divf %230, %231 : vector<8x128xf32>
    %233 = vector.extract_strided_slice %226 {offsets = [0, 128], sizes = [8, 128], strides = [1, 1]} : vector<8x512xf32> to vector<8x128xf32>
    %234 = arith.negf %233 : vector<8x128xf32>
    %235 = math.exp %234 : vector<8x128xf32>
    %cst_61 = arith.constant 1.000000e+00 : f32
    %236 = vector.broadcast %cst_61 : f32 to vector<8x128xf32>
    %237 = arith.addf %236, %235 : vector<8x128xf32>
    %238 = arith.divf %236, %237 : vector<8x128xf32>
    %239 = vector.extract_strided_slice %226 {offsets = [0, 256], sizes = [8, 128], strides = [1, 1]} : vector<8x512xf32> to vector<8x128xf32>
    %240 = math.tanh %239 : vector<8x128xf32>
    %241 = vector.extract_strided_slice %226 {offsets = [0, 384], sizes = [8, 128], strides = [1, 1]} : vector<8x512xf32> to vector<8x128xf32>
    %242 = arith.negf %241 : vector<8x128xf32>
    %243 = math.exp %242 : vector<8x128xf32>
    %cst_62 = arith.constant 1.000000e+00 : f32
    %244 = vector.broadcast %cst_62 : f32 to vector<8x128xf32>
    %245 = arith.addf %244, %243 : vector<8x128xf32>
    %246 = arith.divf %244, %245 : vector<8x128xf32>
    %247 = arith.mulf %238, %219 : vector<8x128xf32>
    %248 = arith.mulf %232, %240 : vector<8x128xf32>
    %249 = arith.addf %247, %248 : vector<8x128xf32>
    %250 = math.tanh %249 : vector<8x128xf32>
    %251 = arith.mulf %246, %250 : vector<8x128xf32>
    %c8_i32 = arith.constant 8 : i32
    %c0_63 = arith.constant 0 : index
    %c0_64 = arith.constant 0 : index
    %252 = vector.load %arg10[%c0_63, %c0_64] : memref<8x128xf32, #tpu.memory_space<vmem>>, vector<8x128xf32>
    tpu.vector_store %arg10[%c0_63, %c0_64], %251 {strides = array<i32>} : memref<8x128xf32, #tpu.memory_space<vmem>>, vector<8x128xf32>,
    %c0_65 = arith.constant 0 : index
    %c0_66 = arith.constant 0 : index
    %253 = vector.load %arg11[%c0_65, %c0_66] : memref<8x128xf32, #tpu.memory_space<vmem>>, vector<8x128xf32>
    tpu.vector_store %arg11[%c0_65, %c0_66], %249 {strides = array<i32>} : memref<8x128xf32, #tpu.memory_space<vmem>>, vector<8x128xf32>,
    %c0_67 = arith.constant 0 : index
    %c0_68 = arith.constant 0 : index
    %254 = vector.load %arg5[%c0_67, %c0_68] : memref<128x128xf32, #tpu.memory_space<vmem>>, vector<128x128xf32>
    %cst_69 = arith.constant dense<0.000000e+00> : vector<8x128xf32>
    %255 = tpu.matmul %251, %254, %cst_69 {dimension_numbers = #tpu.dot_dimension_numbers<[1], [0], [0], [1], [0, 0, 1, 1], [], []>} : vector<8x128xf32>, vector<128x128xf32>, vector<8x128xf32> -> vector<8x128xf32>
    %c0_70 = arith.constant 0 : index
    %c0_71 = arith.constant 0 : index
    %256 = vector.load %arg6[%c0_70, %c0_71] : memref<1x128xf32, #tpu.memory_space<vmem>>, vector<1x128xf32>
    %257 = vector.broadcast %256 : vector<1x128xf32> to vector<8x128xf32>
    %258 = arith.addf %255, %257 : vector<8x128xf32>
    %c0_72 = arith.constant 0 : index
    %c0_73 = arith.constant 0 : index
    %259 = vector.load %arg9[%c0_72, %c0_73] : memref<8x128xf32, #tpu.memory_space<vmem>>, vector<8x128xf32>
    tpu.vector_store %arg9[%c0_72, %c0_73], %258 {strides = array<i32>} : memref<8x128xf32, #tpu.memory_space<vmem>>, vector<8x128xf32>,
    return
  }
  func.func @transform_0(%arg0: i32) -> (i32, i32, i32) {
    %c0_i32 = arith.constant 0 : i32
    %c0_i32_0 = arith.constant 0 : i32
    %c0_i32_1 = arith.constant 0 : i32
    return %c0_i32, %arg0, %c0_i32_0 : i32, i32, i32
  }
  func.func @transform_1(%arg0: i32) -> (i32, i32) {
    %c0_i32 = arith.constant 0 : i32
    %c0_i32_0 = arith.constant 0 : i32
    %c0_i32_1 = arith.constant 0 : i32
    return %c0_i32, %c0_i32_0 : i32, i32
  }
  func.func @transform_2(%arg0: i32) -> (i32, i32) {
    %c0_i32 = arith.constant 0 : i32
    %c0_i32_0 = arith.constant 0 : i32
    %c0_i32_1 = arith.constant 0 : i32
    return %c0_i32, %c0_i32_0 : i32, i32
  }
  func.func @transform_3(%arg0: i32) -> (i32, i32) {
    %c0_i32 = arith.constant 0 : i32
    %c0_i32_0 = arith.constant 0 : i32
    %c0_i32_1 = arith.constant 0 : i32
    return %c0_i32, %c0_i32_0 : i32, i32
  }
  func.func @transform_4(%arg0: i32) -> (i32, i32) {
    %c0_i32 = arith.constant 0 : i32
    %c0_i32_0 = arith.constant 0 : i32
    %c0_i32_1 = arith.constant 0 : i32
    return %c0_i32, %c0_i32_0 : i32, i32
  }
  func.func @transform_5(%arg0: i32) -> (i32, i32) {
    %c0_i32 = arith.constant 0 : i32
    %c0_i32_0 = arith.constant 0 : i32
    %c0_i32_1 = arith.constant 0 : i32
    return %c0_i32, %c0_i32_0 : i32, i32
  }
  func.func @transform_6(%arg0: i32) -> (i32, i32) {
    %c0_i32 = arith.constant 0 : i32
    %c0_i32_0 = arith.constant 0 : i32
    return %arg0, %c0_i32 : i32, i32
  }
  func.func @transform_7(%arg0: i32) -> (i32, i32) {
    %c0_i32 = arith.constant 0 : i32
    %c0_i32_0 = arith.constant 0 : i32
    return %arg0, %c0_i32 : i32, i32
  }
  func.func @transform_8(%arg0: i32) -> (i32, i32) {
    %c0_i32 = arith.constant 0 : i32
    %c0_i32_0 = arith.constant 0 : i32
    return %arg0, %c0_i32 : i32, i32
  }
  func.func @transform_9(%arg0: i32) -> (i32, i32) {
    %c0_i32 = arith.constant 0 : i32
    %c0_i32_0 = arith.constant 0 : i32
    return %arg0, %c0_i32 : i32, i32
  }
  func.func @transform_10(%arg0: i32) -> (i32, i32) {
    %c0_i32 = arith.constant 0 : i32
    %c0_i32_0 = arith.constant 0 : i32
    return %arg0, %c0_i32 : i32, i32
  }
}

</mosaic_0001>

<bundles_post_ra>
// kernel: rnn_dqn_forward.1
= control target key start
LH: loop header
LB: loop body
LE: loop exit
PB: predicated region body
PF: predicated region fallthrough
CT: control target
= control target key end

     0   :  { %s3483_s1 = inlined_call_operand.vmem [shape: f32[128,512], index: 1, kind: input, shape index: {}]   ;;  %s3484_s0 = inlined_call_operand.vmem [shape: f32[8,8,128], index: 0, kind: input, shape index: {}]   ;;  %s3485_s2 = inlined_call_operand.vmem [shape: f32[128,512], index: 2, kind: input, shape index: {}]   ;;  %s3486_s6 = inlined_call_operand.vmem [shape: f32[8,128], index: 6, kind: input, shape index: {}, may-alias: {6,7}]   ;;  %s3487_s3 = inlined_call_operand.vmem [shape: f32[1,512], index: 3, kind: input, shape index: {}]   ;;  %s3488_s7 = inlined_call_operand.vmem [shape: f32[8,128], index: 7, kind: input, shape index: {}, may-alias: {6,7}]   ;;  %s3489_s5 = inlined_call_operand.vmem [shape: f32[1,128], index: 5, kind: input, shape index: {}]   ;;  %s3490_s4 = inlined_call_operand.vmem [shape: f32[128,128], index: 4, kind: input, shape index: {}]   ;;  %s3491_s10 = inlined_call_operand.vmem [shape: f32[8,128], index: 10, kind: output, shape index: {2}]   ;;  %s3492_s9 = inlined_call_operand.vmem [shape: f32[8,128], index: 9, kind: output, shape index: {1}]   ;;  %s3493_s8 = inlined_call_operand.vmem [shape: f32[8,128], index: 8, kind: output, shape index: {0}]  }
   0x1   :  { %v100_v0 = vld [vmem:[%s3483_s1 + $0x1e0] sm:$0xff]  ;;  %v101_v1 = vld [vmem:[%s3483_s1 + $0x1e8] sm:$0xff]  ;;  %v102_v2 = vld [vmem:[%s3483_s1 + $0x1f0] sm:$0xff] }
   0x2   :  { %114 = vmatpush.msra.mxu0 %v100_v0  ;;  %155 = vmatpush.msra.mxu1 %v101_v1  ;;  %v103_v3 = vld [vmem:[%s3483_s1 + $0x1f8] sm:$0xff]  ;;  %v96_v4 = vld [vmem:[%s3483_s1 + $0x1c0] sm:$0xff]  ;;  %v97_v5 = vld [vmem:[%s3483_s1 + $0x1c8] sm:$0xff] }
   0x3   :  { %196 = vmatpush.msra.mxu2 %v102_v2  ;;  %237 = vmatpush.msra.mxu3 %v103_v3  ;;  %v98_v6 = vld [vmem:[%s3483_s1 + $0x1d0] sm:$0xff]  ;;  %v99_v7 = vld [vmem:[%s3483_s1 + $0x1d8] sm:$0xff]  ;;  %v92_v8 = vld [vmem:[%s3483_s1 + $0x1a0] sm:$0xff] }
   0x4   :  { %115 = vmatpush.msra.mxu0 %v96_v4  ;;  %156 = vmatpush.msra.mxu1 %v97_v5  ;;  %v93_v9 = vld [vmem:[%s3483_s1 + $0x1a8] sm:$0xff]  ;;  %v94_v10 = vld [vmem:[%s3483_s1 + $0x1b0] sm:$0xff]  ;;  %v95_v11 = vld [vmem:[%s3483_s1 + $0x1b8] sm:$0xff] }
   0x5   :  { %197 = vmatpush.msra.mxu2 %v98_v6  ;;  %238 = vmatpush.msra.mxu3 %v99_v7  ;;  %v88_v12 = vld [vmem:[%s3483_s1 + $0x180] sm:$0xff]  ;;  %v89_v13 = vld [vmem:[%s3483_s1 + $0x188] sm:$0xff]  ;;  %v90_v14 = vld [vmem:[%s3483_s1 + $0x190] sm:$0xff] }
   0x6   :  { %116 = vmatpush.msra.mxu0 %v92_v8  ;;  %157 = vmatpush.msra.mxu1 %v93_v9  ;;  %v91_v15 = vld [vmem:[%s3483_s1 + $0x198] sm:$0xff]  ;;  %v84_v16 = vld [vmem:[%s3483_s1 + $0x160] sm:$0xff]  ;;  %v85_v17 = vld [vmem:[%s3483_s1 + $0x168] sm:$0xff] }
   0x7   :  { %198 = vmatpush.msra.mxu2 %v94_v10  ;;  %239 = vmatpush.msra.mxu3 %v95_v11  ;;  %v86_v18 = vld [vmem:[%s3483_s1 + $0x170] sm:$0xff]  ;;  %v87_v19 = vld [vmem:[%s3483_s1 + $0x178] sm:$0xff]  ;;  %v80_v20 = vld [vmem:[%s3483_s1 + $0x140] sm:$0xff] }
   0x8   :  { %117 = vmatpush.msra.mxu0 %v88_v12  ;;  %158 = vmatpush.msra.mxu1 %v89_v13  ;;  %v81_v21 = vld [vmem:[%s3483_s1 + $0x148] sm:$0xff]  ;;  %v82_v22 = vld [vmem:[%s3483_s1 + $0x150] sm:$0xff]  ;;  %v83_v23 = vld [vmem:[%s3483_s1 + $0x158] sm:$0xff] }
   0x9   :  { %199 = vmatpush.msra.mxu2 %v90_v14  ;;  %240 = vmatpush.msra.mxu3 %v91_v15  ;;  %v76_v24 = vld [vmem:[%s3483_s1 + $0x120] sm:$0xff]  ;;  %v77_v25 = vld [vmem:[%s3483_s1 + $0x128] sm:$0xff]  ;;  %v78_v26 = vld [vmem:[%s3483_s1 + $0x130] sm:$0xff] }
   0xa   :  { %118 = vmatpush.msra.mxu0 %v84_v16  ;;  %159 = vmatpush.msra.mxu1 %v85_v17  ;;  %v79_v27 = vld [vmem:[%s3483_s1 + $0x138] sm:$0xff]  ;;  %v72_v28 = vld [vmem:[%s3483_s1 + $0x100] sm:$0xff]  ;;  %v73_v29 = vld [vmem:[%s3483_s1 + $0x108] sm:$0xff] }
   0xb   :  { %200 = vmatpush.msra.mxu2 %v86_v18  ;;  %241 = vmatpush.msra.mxu3 %v87_v19  ;;  %v74_v30 = vld [vmem:[%s3483_s1 + $0x110] sm:$0xff]  ;;  %v75_v31 = vld [vmem:[%s3483_s1 + $0x118] sm:$0xff]  ;;  %v68_v32 = vld [vmem:[%s3483_s1 + $0xe0] sm:$0xff] }
   0xc   :  { %119 = vmatpush.msra.mxu0 %v80_v20  ;;  %160 = vmatpush.msra.mxu1 %v81_v21  ;;  %v69_v33 = vld [vmem:[%s3483_s1 + $0xe8] sm:$0xff]  ;;  %v70_v34 = vld [vmem:[%s3483_s1 + $0xf0] sm:$0xff]  ;;  %v71_v35 = vld [vmem:[%s3483_s1 + $0xf8] sm:$0xff] }
   0xd   :  { %201 = vmatpush.msra.mxu2 %v82_v22  ;;  %242 = vmatpush.msra.mxu3 %v83_v23  ;;  %v64_v36 = vld [vmem:[%s3483_s1 + $0xc0] sm:$0xff]  ;;  %v65_v37 = vld [vmem:[%s3483_s1 + $0xc8] sm:$0xff]  ;;  %v66_v38 = vld [vmem:[%s3483_s1 + $0xd0] sm:$0xff] }
   0xe   :  { %120 = vmatpush.msra.mxu0 %v76_v24  ;;  %161 = vmatpush.msra.mxu1 %v77_v25  ;;  %v67_v39 = vld [vmem:[%s3483_s1 + $0xd8] sm:$0xff]  ;;  %v60_v40 = vld [vmem:[%s3483_s1 + $0xa0] sm:$0xff]  ;;  %v61_v41 = vld [vmem:[%s3483_s1 + $0xa8] sm:$0xff] }
   0xf   :  { %202 = vmatpush.msra.mxu2 %v78_v26  ;;  %243 = vmatpush.msra.mxu3 %v79_v27  ;;  %v62_v42 = vld [vmem:[%s3483_s1 + $0xb0] sm:$0xff]  ;;  %v63_v43 = vld [vmem:[%s3483_s1 + $0xb8] sm:$0xff]  ;;  %v56_v44 = vld [vmem:[%s3483_s1 + $0x80] sm:$0xff] }
  0x10   :  { %121 = vmatpush.msra.mxu0 %v72_v28  ;;  %162 = vmatpush.msra.mxu1 %v73_v29  ;;  %v57_v45 = vld [vmem:[%s3483_s1 + $0x88] sm:$0xff]  ;;  %v58_v46 = vld [vmem:[%s3483_s1 + $0x90] sm:$0xff]  ;;  %v59_v47 = vld [vmem:[%s3483_s1 + $0x98] sm:$0xff] }
  0x11   :  { %203 = vmatpush.msra.mxu2 %v74_v30  ;;  %244 = vmatpush.msra.mxu3 %v75_v31  ;;  %v52_v48 = vld [vmem:[%s3483_s1 + $0x60] sm:$0xff]  ;;  %v53_v49 = vld [vmem:[%s3483_s1 + $0x68] sm:$0xff]  ;;  %v54_v50 = vld [vmem:[%s3483_s1 + $0x70] sm:$0xff] }
  0x12   :  { %122 = vmatpush.msra.mxu0 %v68_v32  ;;  %163 = vmatpush.msra.mxu1 %v69_v33  ;;  %v55_v51 = vld [vmem:[%s3483_s1 + $0x78] sm:$0xff]  ;;  %v48_v52 = vld [vmem:[%s3483_s1 + $0x40] sm:$0xff]  ;;  %v49_v53 = vld [vmem:[%s3483_s1 + $0x48] sm:$0xff] }
  0x13   :  { %204 = vmatpush.msra.mxu2 %v70_v34  ;;  %245 = vmatpush.msra.mxu3 %v71_v35  ;;  %v50_v54 = vld [vmem:[%s3483_s1 + $0x50] sm:$0xff]  ;;  %v51_v55 = vld [vmem:[%s3483_s1 + $0x58] sm:$0xff]  ;;  %v44_v56 = vld [vmem:[%s3483_s1 + $0x20] sm:$0xff] }
  0x14   :  { %123 = vmatpush.msra.mxu0 %v64_v36  ;;  %164 = vmatpush.msra.mxu1 %v65_v37  ;;  %v45_v57 = vld [vmem:[%s3483_s1 + $0x28] sm:$0xff]  ;;  %v46_v58 = vld [vmem:[%s3483_s1 + $0x30] sm:$0xff]  ;;  %v47_v59 = vld [vmem:[%s3483_s1 + $0x38] sm:$0xff] }
  0x15   :  { %205 = vmatpush.msra.mxu2 %v66_v38  ;;  %246 = vmatpush.msra.mxu3 %v67_v39  ;;  %v40_v60 = vld [vmem:[%s3483_s1] sm:$0xff]  ;;  %v41_v61 = vld [vmem:[%s3483_s1 + $0x8] sm:$0xff]  ;;  %v42_v62 = vld [vmem:[%s3483_s1 + $0x10] sm:$0xff] }
  0x16   :  { %124 = vmatpush.msra.mxu0 %v60_v40  ;;  %165 = vmatpush.msra.mxu1 %v61_v41  ;;  %v43_v63 = vld [vmem:[%s3483_s1 + $0x18] sm:$0xff]  ;;  %v32_v0 = vld [vmem:[%s3484_s0] sm:$0xff]  ;;  %v2121_v2 = vld [vmem:[%s3485_s2 + $0x1e8] sm:$0xff] }
  0x17   :  { %206 = vmatpush.msra.mxu2 %v62_v42  ;;  %247 = vmatpush.msra.mxu3 %v63_v43  ;;  %v2116_v1 = vld [vmem:[%s3485_s2 + $0x1e0] sm:$0xff]  ;;  %v2126_v3 = vld [vmem:[%s3485_s2 + $0x1f8] sm:$0xff]  ;;  %v2131_v4 = vld [vmem:[%s3485_s2 + $0x1f0] sm:$0xff] }
  0x18   :  { %125 = vmatpush.msra.mxu0 %v56_v44  ;;  %166 = vmatpush.msra.mxu1 %v57_v45  ;;  %v2136_v5 = vld [vmem:[%s3485_s2 + $0x1c0] sm:$0xff]  ;;  %v2141_v6 = vld [vmem:[%s3485_s2 + $0x1c8] sm:$0xff]  ;;  %v2148_v7 = vld [vmem:[%s3485_s2 + $0x1d8] sm:$0xff] }
  0x19   :  { %207 = vmatpush.msra.mxu2 %v58_v46  ;;  %248 = vmatpush.msra.mxu3 %v59_v47  ;;  %v2153_v8 = vld [vmem:[%s3485_s2 + $0x1d0] sm:$0xff]  ;;  %v2159_v9 = vld [vmem:[%s3485_s2 + $0x1a0] sm:$0xff]  ;;  %v2164_v10 = vld [vmem:[%s3485_s2 + $0x1a8] sm:$0xff] }
  0x1a   :  { %126 = vmatpush.msra.mxu0 %v52_v48  ;;  %167 = vmatpush.msra.mxu1 %v53_v49  ;;  %v2172_v11 = vld [vmem:[%s3485_s2 + $0x1b8] sm:$0xff]  ;;  %v2177_v12 = vld [vmem:[%s3485_s2 + $0x1b0] sm:$0xff]  ;;  %v33_v13 = vld [vmem:[%s3484_s0 + $0x8] sm:$0xff] }
  0x1b   :  { %208 = vmatpush.msra.mxu2 %v54_v50  ;;  %249 = vmatpush.msra.mxu3 %v55_v51  ;;  %v2189_v14 = vld [vmem:[%s3485_s2 + $0x180] sm:$0xff]  ;;  %v2194_v15 = vld [vmem:[%s3485_s2 + $0x188] sm:$0xff]  ;;  %v2201_v16 = vld [vmem:[%s3485_s2 + $0x198] sm:$0xff] }
  0x1c   :  { %127 = vmatpush.msra.mxu0 %v48_v52  ;;  %168 = vmatpush.msra.mxu1 %v49_v53  ;;  %v2206_v17 = vld [vmem:[%s3485_s2 + $0x190] sm:$0xff]  ;;  %v2211_v18 = vld [vmem:[%s3485_s2 + $0x160] sm:$0xff]  ;;  %v2216_v19 = vld [vmem:[%s3485_s2 + $0x168] sm:$0xff] }
  0x1d   :  { %209 = vmatpush.msra.mxu2 %v50_v54  ;;  %250 = vmatpush.msra.mxu3 %v51_v55  ;;  %v2223_v20 = vld [vmem:[%s3485_s2 + $0x178] sm:$0xff]  ;;  %v2228_v21 = vld [vmem:[%s3485_s2 + $0x170] sm:$0xff]  ;;  %v2234_v22 = vld [vmem:[%s3485_s2 + $0x140] sm:$0xff] }
  0x1e   :  { %128 = vmatpush.msra.mxu0 %v44_v56  ;;  %169 = vmatpush.msra.mxu1 %v45_v57  ;;  %v2239_v23 = vld [vmem:[%s3485_s2 + $0x148] sm:$0xff]  ;;  %v2247_v24 = vld [vmem:[%s3485_s2 + $0x158] sm:$0xff]  ;;  %v2252_v25 = vld [vmem:[%s3485_s2 + $0x150] sm:$0xff] }
  0x1f   :  { %210 = vmatpush.msra.mxu2 %v46_v58  ;;  %251 = vmatpush.msra.mxu3 %v47_v59  ;;  %v34_v26 = vld [vmem:[%s3484_s0 + $0x10] sm:$0xff]  ;;  %v2264_v27 = vld [vmem:[%s3485_s2 + $0x120] sm:$0xff]  ;;  %v2269_v28 = vld [vmem:[%s3485_s2 + $0x128] sm:$0xff] }
  0x20   :  { %129 = vmatpush.msra.mxu0 %v40_v60  ;;  %170 = vmatpush.msra.mxu1 %v41_v61  ;;  %v2276_v29 = vld [vmem:[%s3485_s2 + $0x138] sm:$0xff]  ;;  %v2281_v30 = vld [vmem:[%s3485_s2 + $0x130] sm:$0xff]  ;;  %v2286_v31 = vld [vmem:[%s3485_s2 + $0x100] sm:$0xff] }
  0x21   :  { %211 = vmatpush.msra.mxu2 %v42_v62  ;;  %252 = vmatpush.msra.mxu3 %v43_v63  ;;  %v2291_v32 = vld [vmem:[%s3485_s2 + $0x108] sm:$0xff]  ;;  %v2298_v33 = vld [vmem:[%s3485_s2 + $0x118] sm:$0xff]  ;;  %v2303_v34 = vld [vmem:[%s3485_s2 + $0x110] sm:$0xff] }
  0x22   :  { %130 = vmatmul.f32.vlgmr.msra.gmra.mxu0 %v32_v0  ;;  %171 = vmatmul.f32.vlgmr.msra.gmra.mxu1 %v32_v0  ;;  %v2309_v35 = vld [vmem:[%s3485_s2 + $0xe0] sm:$0xff]  ;;  %v2314_v36 = vld [vmem:[%s3485_s2 + $0xe8] sm:$0xff]  ;;  %v2322_v37 = vld [vmem:[%s3485_s2 + $0xf8] sm:$0xff] }
  0x23   :  { %212 = vmatmul.f32.vlgmr.msra.gmra.mxu2 %v32_v0  ;;  %253 = vmatmul.f32.vlgmr.msra.gmra.mxu3 %v32_v0  ;;  %v2327_v38 = vld [vmem:[%s3485_s2 + $0xf0] sm:$0xff]  ;;  %v35_v39 = vld [vmem:[%s3484_s0 + $0x18] sm:$0xff]  ;;  %v2339_v40 = vld [vmem:[%s3485_s2 + $0xc0] sm:$0xff] }
  0x24   :  { %380 = vmatpush.msrb.mxu0 %v2116_v1  ;;  %400 = vmatpush.msrb.mxu1 %v2121_v2  ;;  %v2344_v41 = vld [vmem:[%s3485_s2 + $0xc8] sm:$0xff]  ;;  %v2351_v42 = vld [vmem:[%s3485_s2 + $0xd8] sm:$0xff]  ;;  %v2356_v43 = vld [vmem:[%s3485_s2 + $0xd0] sm:$0xff] }
  0x25   :  { %440 = vmatpush.msrb.mxu3 %v2126_v3  ;;  %420 = vmatpush.msrb.mxu2 %v2131_v4  ;;  %3579 = vst [vmem:[#allocation3_spill] sm:$0xff] %v2351_v42  ;;  %v2361_v44 = vld [vmem:[%s3485_s2 + $0xa0] sm:$0xff]  ;;  %v2366_v45 = vld [vmem:[%s3485_s2 + $0xa8] sm:$0xff]  ;;  %v2373_v46 = vld [vmem:[%s3485_s2 + $0xb8] sm:$0xff] }
  0x26   :  { %381 = vmatpush.msrb.mxu0 %v2136_v5  ;;  %401 = vmatpush.msrb.mxu1 %v2141_v6  ;;  %3580 = vst [vmem:[#allocation4_spill] sm:$0xff] %v2361_v44  ;;  %v2378_v47 = vld [vmem:[%s3485_s2 + $0xb0] sm:$0xff]  ;;  %v2384_v48 = vld [vmem:[%s3485_s2 + $0x80] sm:$0xff]  ;;  %v2389_v49 = vld [vmem:[%s3485_s2 + $0x88] sm:$0xff] }
  0x27   :  { %441 = vmatpush.msrb.mxu3 %v2148_v7  ;;  %421 = vmatpush.msrb.mxu2 %v2153_v8  ;;  %3581 = vst [vmem:[#allocation5_spill] sm:$0xff] %v2366_v45  ;;  %v2397_v50 = vld [vmem:[%s3485_s2 + $0x98] sm:$0xff]  ;;  %v2402_v51 = vld [vmem:[%s3485_s2 + $0x90] sm:$0xff]  ;;  %v36_v52 = vld [vmem:[%s3484_s0 + $0x20] sm:$0xff] }
  0x28   :  { %382 = vmatpush.msrb.mxu0 %v2159_v9  ;;  %402 = vmatpush.msrb.mxu1 %v2164_v10  ;;  %3582 = vst [vmem:[#allocation6_spill] sm:$0xff] %v2373_v46  ;;  %v2414_v53 = vld [vmem:[%s3485_s2 + $0x60] sm:$0xff]  ;;  %v2419_v54 = vld [vmem:[%s3485_s2 + $0x68] sm:$0xff]  ;;  %v2426_v55 = vld [vmem:[%s3485_s2 + $0x78] sm:$0xff] }
  0x29   :  { %442 = vmatpush.msrb.mxu3 %v2172_v11  ;;  %422 = vmatpush.msrb.mxu2 %v2177_v12  ;;  %3583 = vst [vmem:[#allocation7_spill] sm:$0xff] %v2378_v47  ;;  %v2431_v56 = vld [vmem:[%s3485_s2 + $0x70] sm:$0xff]  ;;  %v2436_v57 = vld [vmem:[%s3485_s2 + $0x40] sm:$0xff]  ;;  %v2441_v58 = vld [vmem:[%s3485_s2 + $0x48] sm:$0xff] }
  0x2a   :  { %133 = vmatmul.f32.gmra.mxu0 %v33_v13  ;;  %174 = vmatmul.f32.gmra.mxu1 %v33_v13  ;;  %3584 = vst [vmem:[#allocation8_spill] sm:$0xff] %v2384_v48  ;;  %v2448_v59 = vld [vmem:[%s3485_s2 + $0x58] sm:$0xff]  ;;  %v2453_v60 = vld [vmem:[%s3485_s2 + $0x50] sm:$0xff]  ;;  %v2459_v61 = vld [vmem:[%s3485_s2 + $0x20] sm:$0xff] }
  0x2b   :  { %215 = vmatmul.f32.gmra.mxu2 %v33_v13  ;;  %256 = vmatmul.f32.gmra.mxu3 %v33_v13  ;;  %3585 = vst [vmem:[#allocation9_spill] sm:$0xff] %v2389_v49  ;;  %v2464_v62 = vld [vmem:[%s3485_s2 + $0x28] sm:$0xff]  ;;  %v2472_v63 = vld [vmem:[%s3485_s2 + $0x30] sm:$0xff]  ;;  %v2477_v0 = vld [vmem:[%s3485_s2 + $0x38] sm:$0xff] }
  0x2c   :  { %383 = vmatpush.msrb.mxu0 %v2189_v14  ;;  %403 = vmatpush.msrb.mxu1 %v2194_v15  ;;  %3586 = vst [vmem:[#allocation10_spill] sm:$0xff] %v2397_v50  ;;  %v37_v13 = vld [vmem:[%s3484_s0 + $0x28] sm:$0xff] }
  0x2d   :  { %443 = vmatpush.msrb.mxu3 %v2201_v16  ;;  %423 = vmatpush.msrb.mxu2 %v2206_v17  ;;  %3587 = vst [vmem:[#allocation11_spill] sm:$0xff] %v2402_v51 }
  0x2e   :  { %384 = vmatpush.msrb.mxu0 %v2211_v18  ;;  %404 = vmatpush.msrb.mxu1 %v2216_v19  ;;  %3588 = vst [vmem:[#allocation12_spill] sm:$0xff] %v2414_v53 }
  0x2f   :  { %444 = vmatpush.msrb.mxu3 %v2223_v20  ;;  %424 = vmatpush.msrb.mxu2 %v2228_v21  ;;  %3589 = vst [vmem:[#allocation13_spill] sm:$0xff] %v2419_v54 }
  0x30   :  { %385 = vmatpush.msrb.mxu0 %v2234_v22  ;;  %405 = vmatpush.msrb.mxu1 %v2239_v23  ;;  %3590 = vst [vmem:[#allocation14_spill] sm:$0xff] %v2426_v55 }
  0x31   :  { %445 = vmatpush.msrb.mxu3 %v2247_v24  ;;  %425 = vmatpush.msrb.mxu2 %v2252_v25  ;;  %3591 = vst [vmem:[#allocation15_spill] sm:$0xff] %v2431_v56 }
  0x32   :  { %136 = vmatmul.f32.gmra.mxu0 %v34_v26  ;;  %177 = vmatmul.f32.gmra.mxu1 %v34_v26  ;;  %3592 = vst [vmem:[#allocation16_spill] sm:$0xff] %v2436_v57 }
  0x33   :  { %218 = vmatmul.f32.gmra.mxu2 %v34_v26  ;;  %259 = vmatmul.f32.gmra.mxu3 %v34_v26  ;;  %3593 = vst [vmem:[#allocation17_spill] sm:$0xff] %v2441_v58  ;;  %v2489_v26 = vld [vmem:[%s3485_s2] sm:$0xff] }
  0x34   :  { %386 = vmatpush.msrb.mxu0 %v2264_v27  ;;  %406 = vmatpush.msrb.mxu1 %v2269_v28  ;;  %3594 = vst [vmem:[#allocation18_spill] sm:$0xff] %v2448_v59 }
  0x35   :  { %446 = vmatpush.msrb.mxu3 %v2276_v29  ;;  %426 = vmatpush.msrb.mxu2 %v2281_v30  ;;  %3595 = vst [vmem:[#allocation19_spill] sm:$0xff] %v2453_v60 }
  0x36   :  { %387 = vmatpush.msrb.mxu0 %v2286_v31  ;;  %407 = vmatpush.msrb.mxu1 %v2291_v32  ;;  %3596 = vst [vmem:[#allocation20_spill] sm:$0xff] %v2459_v61 }
  0x37   :  { %447 = vmatpush.msrb.mxu3 %v2298_v33  ;;  %427 = vmatpush.msrb.mxu2 %v2303_v34  ;;  %3597 = vst [vmem:[#allocation21_spill] sm:$0xff] %v2464_v62 }
  0x38   :  { %388 = vmatpush.msrb.mxu0 %v2309_v35  ;;  %408 = vmatpush.msrb.mxu1 %v2314_v36  ;;  %3598 = vst [vmem:[#allocation22_spill] sm:$0xff] %v2472_v63 }
  0x39   :  { %448 = vmatpush.msrb.mxu3 %v2322_v37  ;;  %428 = vmatpush.msrb.mxu2 %v2327_v38  ;;  %3599 = vst [vmem:[#allocation23_spill] sm:$0xff] %v2477_v0 }
  0x3a   :  { %139 = vmatmul.f32.gmra.mxu0 %v35_v39  ;;  %180 = vmatmul.f32.gmra.mxu1 %v35_v39  ;;  %3600 = vst [vmem:[#allocation24_spill] sm:$0xff] %v2489_v26 }
  0x3b   :  { %221 = vmatmul.f32.gmra.mxu2 %v35_v39  ;;  %262 = vmatmul.f32.gmra.mxu3 %v35_v39  ;;  %v2494_v39 = vld [vmem:[%s3485_s2 + $0x8] sm:$0xff] }
  0x3c   :  { %389 = vmatpush.msrb.mxu0 %v2339_v40  ;;  %409 = vmatpush.msrb.mxu1 %v2344_v41  ;;  %3601 = vst [vmem:[#allocation25_spill] sm:$0xff] %v2494_v39 }
  0x3d   :  { %449 = vmatpush.msrb.mxu3 %v2351_v42  ;;  %429 = vmatpush.msrb.mxu2 %v2356_v43 }
  0x3e   :  { %390 = vmatpush.msrb.mxu0 %v2361_v44  ;;  %410 = vmatpush.msrb.mxu1 %v2366_v45 }
  0x3f   :  { %450 = vmatpush.msrb.mxu3 %v2373_v46  ;;  %430 = vmatpush.msrb.mxu2 %v2378_v47 }
  0x40   :  { %391 = vmatpush.msrb.mxu0 %v2384_v48  ;;  %411 = vmatpush.msrb.mxu1 %v2389_v49 }
  0x41   :  { %451 = vmatpush.msrb.mxu3 %v2397_v50  ;;  %431 = vmatpush.msrb.mxu2 %v2402_v51 }
  0x42   :  { %142 = vmatmul.f32.gmra.mxu0 %v36_v52  ;;  %183 = vmatmul.f32.gmra.mxu1 %v36_v52 }
  0x43   :  { %224 = vmatmul.f32.gmra.mxu2 %v36_v52  ;;  %265 = vmatmul.f32.gmra.mxu3 %v36_v52  ;;  %v2501_v52 = vld [vmem:[%s3485_s2 + $0x10] sm:$0xff] }
  0x44   :  { %392 = vmatpush.msrb.mxu0 %v2414_v53  ;;  %412 = vmatpush.msrb.mxu1 %v2419_v54  ;;  %3602 = vst [vmem:[#allocation26_spill] sm:$0xff] %v2501_v52 }
  0x45   :  { %452 = vmatpush.msrb.mxu3 %v2426_v55  ;;  %432 = vmatpush.msrb.mxu2 %v2431_v56 }
  0x46   :  { %393 = vmatpush.msrb.mxu0 %v2436_v57  ;;  %413 = vmatpush.msrb.mxu1 %v2441_v58 }
  0x47   :  { %453 = vmatpush.msrb.mxu3 %v2448_v59  ;;  %433 = vmatpush.msrb.mxu2 %v2453_v60 }
  0x48   :  { %394 = vmatpush.msrb.mxu0 %v2459_v61  ;;  %414 = vmatpush.msrb.mxu1 %v2464_v62  ;;  %v2506_v62 = vld [vmem:[%s3485_s2 + $0x18] sm:$0xff] }
  0x49   :  { %434 = vmatpush.msrb.mxu2 %v2472_v63  ;;  %454 = vmatpush.msrb.mxu3 %v2477_v0  ;;  %3603 = vst [vmem:[#allocation27_spill] sm:$0xff] %v2506_v62  ;;  %v38_v0 = vld [vmem:[%s3484_s0 + $0x30] sm:$0xff] }
  0x4a   :  { %145 = vmatmul.f32.gmra.mxu0 %v37_v13  ;;  %186 = vmatmul.f32.gmra.mxu1 %v37_v13 }
  0x4b   :  { %227 = vmatmul.f32.gmra.mxu2 %v37_v13  ;;  %268 = vmatmul.f32.gmra.mxu3 %v37_v13  ;;  %v39_v13 = vld [vmem:[%s3484_s0 + $0x38] sm:$0xff] }
  0x4c   :  { %395 = vmatpush.msrb.mxu0 %v2489_v26  ;;  %415 = vmatpush.msrb.mxu1 %v2494_v39 }
  0x4d   :  { %435 = vmatpush.msrb.mxu2 %v2501_v52  ;;  %455 = vmatpush.msrb.mxu3 %v2506_v62 }
  0x4e   :  { %532 = vmatpush.msra.mxu0 %v2116_v1  ;;  %552 = vmatpush.msra.mxu1 %v2121_v2 }
  0x4f   :  { %572 = vmatpush.msra.mxu2 %v2131_v4  ;;  %592 = vmatpush.msra.mxu3 %v2126_v3 }
  0x50   :  { %533 = vmatpush.msra.mxu0 %v2136_v5  ;;  %553 = vmatpush.msra.mxu1 %v2141_v6 }
  0x51   :  { %573 = vmatpush.msra.mxu2 %v2153_v8  ;;  %593 = vmatpush.msra.mxu3 %v2148_v7 }
  0x52   :  { %148 = vmatmul.f32.gmra.mxu0 %v38_v0  ;;  %189 = vmatmul.f32.gmra.mxu1 %v38_v0 }
  0x53   :  { %230 = vmatmul.f32.gmra.mxu2 %v38_v0  ;;  %271 = vmatmul.f32.gmra.mxu3 %v38_v0  ;;  %v374_v0 = vld [vmem:[%s3486_s6] sm:$0xff] }
  0x54   :  { %534 = vmatpush.msra.mxu0 %v2159_v9  ;;  %554 = vmatpush.msra.mxu1 %v2164_v10 }
  0x55   :  { %574 = vmatpush.msra.mxu2 %v2177_v12  ;;  %594 = vmatpush.msra.mxu3 %v2172_v11 }
  0x56   :  { %535 = vmatpush.msra.mxu0 %v2189_v14  ;;  %555 = vmatpush.msra.mxu1 %v2194_v15 }
  0x57   :  { %575 = vmatpush.msra.mxu2 %v2206_v17  ;;  %595 = vmatpush.msra.mxu3 %v2201_v16 }
  0x58   :  { %536 = vmatpush.msra.mxu0 %v2211_v18  ;;  %556 = vmatpush.msra.mxu1 %v2216_v19 }
  0x59   :  { %576 = vmatpush.msra.mxu2 %v2228_v21  ;;  %596 = vmatpush.msra.mxu3 %v2223_v20 }
  0x5a   :  { %151 = vmatmul.f32.gmra.mxu0 %v39_v13  ;;  %192 = vmatmul.f32.gmra.mxu1 %v39_v13 }
  0x5b   :  { %233 = vmatmul.f32.gmra.mxu2 %v39_v13  ;;  %274 = vmatmul.f32.gmra.mxu3 %v39_v13  ;;  %v3604_v13 = vld [vmem:[#allocation21_spill] sm:$0xff] }
  0x5c   :  { %537 = vmatpush.msra.mxu0 %v2234_v22  ;;  %557 = vmatpush.msra.mxu1 %v2239_v23 }
  0x5d   :  { %577 = vmatpush.msra.mxu2 %v2252_v25  ;;  %597 = vmatpush.msra.mxu3 %v2247_v24 }
  0x5e   :  { %538 = vmatpush.msra.mxu0 %v2264_v27  ;;  %558 = vmatpush.msra.mxu1 %v2269_v28 }
  0x5f   :  { %578 = vmatpush.msra.mxu2 %v2281_v30  ;;  %598 = vmatpush.msra.mxu3 %v2276_v29 }
  0x60   :  { %539 = vmatpush.msra.mxu0 %v2286_v31  ;;  %559 = vmatpush.msra.mxu1 %v2291_v32 }
  0x61   :  { %579 = vmatpush.msra.mxu2 %v2303_v34  ;;  %599 = vmatpush.msra.mxu3 %v2298_v33 }
  0x62   :  { %396 = vmatmul.f32.vlgmr.msrb.gmra.mxu0 %v374_v0  ;;  %416 = vmatmul.f32.vlgmr.msrb.gmra.mxu1 %v374_v0 }
  0x63   :  { %436 = vmatmul.f32.vlgmr.msrb.gmra.mxu2 %v374_v0  ;;  %456 = vmatmul.f32.vlgmr.msrb.gmra.mxu3 %v374_v0  ;;  %v3605_v0 = vld [vmem:[#allocation23_spill] sm:$0xff] }
  0x64   :  { %540 = vmatpush.msra.mxu0 %v2309_v35  ;;  %560 = vmatpush.msra.mxu1 %v2314_v36 }
  0x65   :  { %580 = vmatpush.msra.mxu2 %v2327_v38  ;;  %600 = vmatpush.msra.mxu3 %v2322_v37 }
  0x66   :  { %541 = vmatpush.msra.mxu0 %v2339_v40  ;;  %561 = vmatpush.msra.mxu1 %v2344_v41 }
  0x67   :  { %581 = vmatpush.msra.mxu2 %v2356_v43  ;;  %601 = vmatpush.msra.mxu3 %v2351_v42 }
  0x68   :  { %542 = vmatpush.msra.mxu0 %v2361_v44  ;;  %562 = vmatpush.msra.mxu1 %v2366_v45 }
  0x69   :  { %582 = vmatpush.msra.mxu2 %v2378_v47  ;;  %602 = vmatpush.msra.mxu3 %v2373_v46 }
  0x6a   :  { %543 = vmatpush.msra.mxu0 %v2384_v48  ;;  %563 = vmatpush.msra.mxu1 %v2389_v49 }
  0x6b   :  { %583 = vmatpush.msra.mxu2 %v2402_v51  ;;  %603 = vmatpush.msra.mxu3 %v2397_v50 }
  0x6c   :  { %544 = vmatpush.msra.mxu0 %v2414_v53  ;;  %564 = vmatpush.msra.mxu1 %v2419_v54 }
  0x6d   :  { %584 = vmatpush.msra.mxu2 %v2431_v56  ;;  %604 = vmatpush.msra.mxu3 %v2426_v55 }
  0x6e   :  { %545 = vmatpush.msra.mxu0 %v2436_v57  ;;  %565 = vmatpush.msra.mxu1 %v2441_v58 }
  0x6f   :  { %585 = vmatpush.msra.mxu2 %v2453_v60  ;;  %605 = vmatpush.msra.mxu3 %v2448_v59 }
  0x70   :  { %546 = vmatpush.msra.mxu0 %v2459_v61  ;;  %566 = vmatpush.msra.mxu1 %v3604_v13 }
  0x71   :  { %586 = vmatpush.msra.mxu2 %v2472_v63  ;;  %606 = vmatpush.msra.mxu3 %v3605_v0 }
  0x72   :  { %547 = vmatpush.msra.mxu0 %v2489_v26  ;;  %567 = vmatpush.msra.mxu1 %v2494_v39 }
  0x73   :  { %587 = vmatpush.msra.mxu2 %v2501_v52  ;;  %607 = vmatpush.msra.mxu3 %v2506_v62 }
  0x74   :  { %684 = vmatpush.msrb.mxu0 %v2116_v1  ;;  %704 = vmatpush.msrb.mxu1 %v2121_v2 }
  0x75   :  { %724 = vmatpush.msrb.mxu2 %v2131_v4  ;;  %744 = vmatpush.msrb.mxu3 %v2126_v3 }
  0x76   :  { %685 = vmatpush.msrb.mxu0 %v2136_v5  ;;  %705 = vmatpush.msrb.mxu1 %v2141_v6 }
  0x77   :  { %725 = vmatpush.msrb.mxu2 %v2153_v8  ;;  %745 = vmatpush.msrb.mxu3 %v2148_v7 }
  0x78   :  { %686 = vmatpush.msrb.mxu0 %v2159_v9  ;;  %706 = vmatpush.msrb.mxu1 %v2164_v10 }
  0x79   :  { %726 = vmatpush.msrb.mxu2 %v2177_v12  ;;  %746 = vmatpush.msrb.mxu3 %v2172_v11 }
  0x7a   :  { %687 = vmatpush.msrb.mxu0 %v2189_v14  ;;  %707 = vmatpush.msrb.mxu1 %v2194_v15 }
  0x7b   :  { %727 = vmatpush.msrb.mxu2 %v2206_v17  ;;  %747 = vmatpush.msrb.mxu3 %v2201_v16 }
  0x7c   :  { %688 = vmatpush.msrb.mxu0 %v2211_v18  ;;  %708 = vmatpush.msrb.mxu1 %v2216_v19 }
  0x7d   :  { %728 = vmatpush.msrb.mxu2 %v2228_v21  ;;  %748 = vmatpush.msrb.mxu3 %v2223_v20 }
  0x7e   :  { %689 = vmatpush.msrb.mxu0 %v2234_v22  ;;  %709 = vmatpush.msrb.mxu1 %v2239_v23 }
  0x7f   :  { %729 = vmatpush.msrb.mxu2 %v2252_v25  ;;  %749 = vmatpush.msrb.mxu3 %v2247_v24 }
  0x80   :  { %690 = vmatpush.msrb.mxu0 %v2264_v27  ;;  %710 = vmatpush.msrb.mxu1 %v2269_v28 }
  0x81   :  { %730 = vmatpush.msrb.mxu2 %v2281_v30  ;;  %750 = vmatpush.msrb.mxu3 %v2276_v29 }
  0x82   :  { %691 = vmatpush.msrb.mxu0 %v2286_v31  ;;  %711 = vmatpush.msrb.mxu1 %v2291_v32 }
  0x83   :  { %731 = vmatpush.msrb.mxu2 %v2303_v34  ;;  %751 = vmatpush.msrb.mxu3 %v2298_v33 }
  0x84   :  { %692 = vmatpush.msrb.mxu0 %v2309_v35  ;;  %712 = vmatpush.msrb.mxu1 %v2314_v36 }
  0x85   :  { %732 = vmatpush.msrb.mxu2 %v2327_v38  ;;  %752 = vmatpush.msrb.mxu3 %v2322_v37 }
  0x86   :  { %693 = vmatpush.msrb.mxu0 %v2339_v40  ;;  %713 = vmatpush.msrb.mxu1 %v2344_v41 }
  0x87   :  { %733 = vmatpush.msrb.mxu2 %v2356_v43  ;;  %753 = vmatpush.msrb.mxu3 %v2351_v42 }
  0x88   :  { %694 = vmatpush.msrb.mxu0 %v2361_v44  ;;  %714 = vmatpush.msrb.mxu1 %v2366_v45 }
  0x89   :  { %734 = vmatpush.msrb.mxu2 %v2378_v47  ;;  %754 = vmatpush.msrb.mxu3 %v2373_v46 }
  0x8a   :  { %695 = vmatpush.msrb.mxu0 %v2384_v48  ;;  %715 = vmatpush.msrb.mxu1 %v2389_v49 }
  0x8b   :  { %735 = vmatpush.msrb.mxu2 %v2402_v51  ;;  %755 = vmatpush.msrb.mxu3 %v2397_v50 }
  0x8c   :  { %696 = vmatpush.msrb.mxu0 %v2414_v53  ;;  %716 = vmatpush.msrb.mxu1 %v2419_v54 }
  0x8d   :  { %736 = vmatpush.msrb.mxu2 %v2431_v56  ;;  %756 = vmatpush.msrb.mxu3 %v2426_v55 }
  0x8e   :  { %697 = vmatpush.msrb.mxu0 %v2436_v57  ;;  %717 = vmatpush.msrb.mxu1 %v2441_v58 }
  0x8f   :  { %737 = vmatpush.msrb.mxu2 %v2453_v60  ;;  %757 = vmatpush.msrb.mxu3 %v2448_v59 }
  0x90   :  { %698 = vmatpush.msrb.mxu0 %v2459_v61  ;;  %718 = vmatpush.msrb.mxu1 %v3604_v13  ;;  %v104_v61 = vld [vmem:[%s3487_s3] sm:$0xf] }
  0x91   :  { %738 = vmatpush.msrb.mxu2 %v2472_v63  ;;  %758 = vmatpush.msrb.mxu3 %v3605_v0  ;;  %v106_v59 = vperm.slane %v104_v61, 0  ;;  %v107_v13 = vperm.slane %v104_v61, 1 }
  0x92   :  { %699 = vmatpush.msrb.mxu0 %v2489_v26  ;;  %719 = vmatpush.msrb.mxu1 %v2494_v39 }
  0x93   :  { %739 = vmatpush.msrb.mxu2 %v2501_v52  ;;  %759 = vmatpush.msrb.mxu3 %v2506_v62  ;;  %v2660_v52 = vperm.slane %v104_v61, 2  ;;  %v109_v62 = vperm.slane %v104_v61, 3 }
  0x9f   :  { %v131_v58 = vpop.f32.mrf.mxu0  ;;  %v172_v60 = vpop.f32.mrf.mxu1 }
  0xa6   :  { %v2652_v57 = vpop.f32.mrf.mxu2  ;;  %v2654_v63 = vpop.f32.mrf.mxu3 }
  0xa7   :  { %v134_v0 = vpop.f32.mrf.mxu0  ;;  %v175_v26 = vpop.f32.mrf.mxu1 }
  0xa8   :  { %v2656_v55 = vadd.f32 %v134_v0, %v106_v59  ;;  %v2658_v39 = vadd.f32 %v175_v26, %v107_v13 }
  0xaa   :  { %3606 = vst [vmem:[#allocation28_spill] sm:$0xff] %v2656_v55 }
  0xab   :  { %3607 = vst [vmem:[#allocation29_spill] sm:$0xff] %v2658_v39 }
  0xae   :  { %v216_v56 = vpop.f32.mrf.mxu2  ;;  %v257_v54 = vpop.f32.mrf.mxu3 }
  0xaf   :  { %v2663_v53 = vadd.f32 %v216_v56, %v2660_v52  ;;  %v2665_v50 = vadd.f32 %v257_v54, %v109_v62  ;;  %v137_v51 = vpop.f32.mrf.mxu0  ;;  %v178_v49 = vpop.f32.mrf.mxu1 }
  0xb0   :  { %v2667_v48 = vadd.f32 %v137_v51, %v106_v59  ;;  %v2669_v46 = vadd.f32 %v178_v49, %v107_v13 }
  0xb1   :  { %3608 = vst [vmem:[#allocation30_spill] sm:$0xff] %v2663_v53 }
  0xb2   :  { %3609 = vst [vmem:[#allocation31_spill] sm:$0xff] %v2665_v50 }
  0xb3   :  { %3610 = vst [vmem:[#allocation32_spill] sm:$0xff] %v2667_v48 }
  0xb4   :  { %3611 = vst [vmem:[#allocation33_spill] sm:$0xff] %v2669_v46 }
  0xb6   :  { %v219_v0 = vpop.f32.mrf.mxu2  ;;  %v260_v55 = vpop.f32.mrf.mxu3 }
  0xb7   :  { %v2672_v26 = vadd.f32 %v219_v0, %v2660_v52  ;;  %v2674_v39 = vadd.f32 %v260_v55, %v109_v62  ;;  %v140_v61 = vpop.f32.mrf.mxu0  ;;  %v181_v47 = vpop.f32.mrf.mxu1 }
  0xb8   :  { %v2676_v45 = vadd.f32 %v140_v61, %v106_v59  ;;  %v2678_v56 = vadd.f32 %v181_v47, %v107_v13 }
  0xb9   :  { %3612 = vst [vmem:[#allocation34_spill] sm:$0xff] %v2672_v26 }
  0xba   :  { %3613 = vst [vmem:[#allocation35_spill] sm:$0xff] %v2674_v39 }
  0xbb   :  { %3614 = vst [vmem:[#allocation36_spill] sm:$0xff] %v2676_v45 }
  0xbc   :  { %3615 = vst [vmem:[#allocation37_spill] sm:$0xff] %v2678_v56 }
  0xbe   :  { %v222_v54 = vpop.f32.mrf.mxu2  ;;  %v263_v53 = vpop.f32.mrf.mxu3 }
  0xbf   :  { %v2681_v51 = vadd.f32 %v222_v54, %v2660_v52  ;;  %v2683_v49 = vadd.f32 %v263_v53, %v109_v62  ;;  %v143_v46 = vpop.f32.mrf.mxu0  ;;  %v184_v48 = vpop.f32.mrf.mxu1 }
  0xc0   :  { %v2685_v50 = vadd.f32 %v143_v46, %v106_v59  ;;  %v2687_v0 = vadd.f32 %v184_v48, %v107_v13 }
  0xc1   :  { %3616 = vst [vmem:[#allocation38_spill] sm:$0xff] %v2681_v51 }
  0xc2   :  { %3617 = vst [vmem:[#allocation39_spill] sm:$0xff] %v2683_v49 }
  0xc3   :  { %3618 = vst [vmem:[#allocation40_spill] sm:$0xff] %v2685_v50 }
  0xc4   :  { %3619 = vst [vmem:[#allocation41_spill] sm:$0xff] %v2687_v0 }
  0xc6   :  { %v225_v55 = vpop.f32.mrf.mxu2  ;;  %v266_v26 = vpop.f32.mrf.mxu3 }
  0xc7   :  { %v2690_v61 = vadd.f32 %v225_v55, %v2660_v52  ;;  %v2692_v47 = vadd.f32 %v266_v26, %v109_v62  ;;  %v146_v56 = vpop.f32.mrf.mxu0  ;;  %v187_v45 = vpop.f32.mrf.mxu1 }
  0xc8   :  { %v2694_v39 = vadd.f32 %v146_v56, %v106_v59  ;;  %v2696_v54 = vadd.f32 %v187_v45, %v107_v13 }
  0xc9   :  { %3620 = vst [vmem:[#allocation42_spill] sm:$0xff] %v2690_v61 }
  0xca   :  { %3621 = vst [vmem:[#allocation43_spill] sm:$0xff] %v2692_v47 }
  0xcb   :  { %3622 = vst [vmem:[#allocation44_spill] sm:$0xff] %v2694_v39 }
  0xcc   :  { %3623 = vst [vmem:[#allocation45_spill] sm:$0xff] %v2696_v54 }
  0xce   :  { %v228_v53 = vpop.f32.mrf.mxu2  ;;  %v269_v51 = vpop.f32.mrf.mxu3 }
  0xcf   :  { %v2699_v46 = vadd.f32 %v228_v53, %v2660_v52  ;;  %v2701_v48 = vadd.f32 %v269_v51, %v109_v62  ;;  %v149_v0 = vpop.f32.mrf.mxu0  ;;  %v190_v50 = vpop.f32.mrf.mxu1  ;;  %v132_v51 = vadd.f32 %v131_v58, %v106_v59 }
  0xd0   :  { %v2703_v49 = vadd.f32 %v149_v0, %v106_v59  ;;  %v2705_v55 = vadd.f32 %v190_v50, %v107_v13 }
  0xd1   :  { %3624 = vst [vmem:[#allocation46_spill] sm:$0xff] %v2699_v46  ;;  %v173_v46 = vadd.f32 %v172_v60, %v107_v13 }
  0xd2   :  { %3625 = vst [vmem:[#allocation47_spill] sm:$0xff] %v2701_v48 }
  0xd3   :  { %3626 = vst [vmem:[#allocation48_spill] sm:$0xff] %v2703_v49 }
  0xd4   :  { %3627 = vst [vmem:[#allocation49_spill] sm:$0xff] %v2705_v55 }
  0xd6   :  { %v231_v26 = vpop.f32.mrf.mxu2  ;;  %v272_v61 = vpop.f32.mrf.mxu3 }
  0xd7   :  { %v2708_v56 = vadd.f32 %v231_v26, %v2660_v52  ;;  %v2710_v45 = vadd.f32 %v272_v61, %v109_v62  ;;  %v152_v54 = vpop.f32.mrf.mxu0  ;;  %v193_v39 = vpop.f32.mrf.mxu1 }
  0xd8   :  { %v2712_v47 = vadd.f32 %v152_v54, %v106_v59  ;;  %v2714_v53 = vadd.f32 %v193_v39, %v107_v13  ;;  %v255_v54 = vadd.f32 %v2654_v63, %v109_v62 }
  0xd9   :  { %3628 = vst [vmem:[#allocation50_spill] sm:$0xff] %v2708_v56 }
  0xda   :  { %3629 = vst [vmem:[#allocation51_spill] sm:$0xff] %v2710_v45 }
  0xdb   :  { %3630 = vst [vmem:[#allocation52_spill] sm:$0xff] %v2712_v47 }
  0xdc   :  { %3631 = vst [vmem:[#allocation53_spill] sm:$0xff] %v2714_v53 }
  0xde   :  { %v234_v48 = vpop.f32.mrf.mxu2  ;;  %v275_v0 = vpop.f32.mrf.mxu3 }
  0xdf   :  { %v2717_v50 = vadd.f32 %v234_v48, %v2660_v52  ;;  %v2719_v55 = vadd.f32 %v275_v0, %v109_v62  ;;  %v397_v49 = vpop.f32.mrf.mxu0  ;;  %v417_v26 = vpop.f32.mrf.mxu1 }
  0xe0   :  { %v460_v56 = vadd.f32 %v397_v49, %v132_v51  ;;  %v461_v61 = vadd.f32 %v417_v26, %v173_v46  ;;  %v214_v49 = vadd.f32 %v2652_v57, %v2660_v52 }
  0xe1   :  { %3632 = vst [vmem:[#allocation54_spill] sm:$0xff] %v2717_v50 }
  0xe2   :  { %3633 = vst [vmem:[#allocation55_spill] sm:$0xff] %v2719_v55  ;;  %v1646_v45 = vmul.f32 -1.442695, %v460_v56  ;;  %v1647_v44 = vmul.f32 -1.442695, %v461_v61 }
  0xe4   :  { %1671 = vpow2.f32 %v1646_v45 }
  0xe5   :  { %1673 = vpow2.f32 %v1647_v44 }
  0xe6   :  { %v457_v39 = vpop.f32.mrf.mxu3  ;;  %v437_v0 = vpop.f32.mrf.mxu2 }
  0xe7   :  { %v463_v58 = vadd.f32 %v457_v39, %v255_v54  ;;  %v462_v45 = vadd.f32 %v437_v0, %v214_v49 }
  0xe9   :  { %v1648_v59 = vmul.f32 -1.442695, %v463_v58 }
  0xea   :  { %v1672_v60 = vpop.eup %1671 }
  0xeb   :  { %v1674_v13 = vpop.eup %1673  ;;  %v467_v53 = vadd.f32 1.0, %v1672_v60  ;;  %1675 = vpow2.f32 %v1648_v59 }
  0xec   :  { %v486_v48 = vadd.f32 1.0, %v1674_v13 }
  0xed   :  { %1677 = vrcp.f32 %v467_v53  ;;  %v479_v61 = vand.u32 2147483648, %v467_v53  ;;  %v477_v58 = vand.u32 2147483647, %v467_v53  ;;  %vm473_vm2 = vweird.f32 %v467_v53 }
  0xee   :  { %1679 = vrcp.f32 %v486_v48  ;;  %v498_v54 = vand.u32 2147483648, %v486_v48  ;;  %v496_v60 = vand.u32 2147483647, %v486_v48  ;;  %vm492_vm3 = vweird.f32 %v486_v48 }
  0xef   :  { %v480_v52 = vor.u32 1.1754944e-38, %v479_v61  ;;  %vm478_vm6 = vcmp.eq.f32.partialorder %v477_v58, 8.507059e+37 }
  0xf0   :  { %v499_v49 = vor.u32 1.1754944e-38, %v498_v54  ;;  %vm497_vm7 = vcmp.eq.f32.partialorder %v496_v60, 8.507059e+37 }
  0xf1   :  { %v1676_v50 = vpop.eup %1675 }
  0xf2   :  { %v506_v46 = vadd.f32 1.0, %v1676_v50 }
  0xf3   :  { %v1678_v56 = vpop.eup %1677 }
  0xf4   :  { %v1680_v62 = vpop.eup %1679  ;;  %v469_v44 = vmul.f32 %v1678_v56, %v467_v53  ;;  %1681 = vrcp.f32 %v506_v46  ;;  %vm474_vm0 = vweird.f32 %v1678_v56  ;;  %v518_v54 = vand.u32 2147483648, %v506_v46 }
  0xf5   :  { %v488_v63 = vmul.f32 %v1680_v62, %v486_v48  ;;  %1683 = vtanh.f32 %v462_v45  ;;  %vm493_vm1 = vweird.f32 %v1680_v62  ;;  %vm475_vm4 = vmor %vm473_vm2, %vm474_vm0  ;;  %v375_v45 = vld [vmem:[%s3488_s7] sm:$0xff]  ;;  %vm512_vm9 = vweird.f32 %v506_v46 }
  0xf6   :  { %v470_v51 = vsub.f32 1.0, %v469_v44  ;;  %vm494_vm5 = vmor %vm492_vm3, %vm493_vm1  ;;  %v516_v42 = vand.u32 2147483647, %v506_v46  ;;  %v519_v58 = vor.u32 1.1754944e-38, %v518_v54 }
  0xf7   :  { %v489_v26 = vsub.f32 1.0, %v488_v63 }
  0xf8   :  { %v471_v39 = vmul.f32 %v1678_v56, %v470_v51  ;;  %vm517_vm11 = vcmp.eq.f32.partialorder %v516_v42, 8.507059e+37 }
  0xf9   :  { %v490_v59 = vmul.f32 %v1680_v62, %v489_v26 }
  0xfa   :  { %v1682_v13 = vpop.eup %1681  ;;  %v472_v57 = vadd.f32 %v1678_v56, %v471_v39 }
  0xfb   :  { %v491_v50 = vadd.f32 %v1680_v62, %v490_v59  ;;  %v508_v0 = vmul.f32 %v1682_v13, %v506_v46  ;;  %v1684_v63 = vpop.eup %1683  ;;  %vm513_vm8 = vweird.f32 %v1682_v13 }
  0xfc   :  { %v476_v44 = vsel %vm475_vm4, %v1678_v56, %v472_v57  ;;  %vm514_vm10 = vmor %vm512_vm9, %vm513_vm8 }
  0xfd   :  { %v481_v51 = vsel %vm478_vm6, %v480_v52, %v476_v44  ;;  %v495_v26 = vsel %vm494_vm5, %v1680_v62, %v491_v50  ;;  %v509_v55 = vsub.f32 1.0, %v508_v0  ;;  %v3662_v50 = vld [vmem:[#allocation30_spill] sm:$0xff] }
  0xfe   :  { %v500_v39 = vsel %vm497_vm7, %v499_v49, %v495_v26  ;;  %v523_v53 = vmul.f32 %v1684_v63, %v481_v51 }
  0xff   :  { %v522_v48 = vmul.f32 %v500_v39, %v375_v45  ;;  %v510_v47 = vmul.f32 %v1682_v13, %v509_v55 }
 0x101   :  { %v2727_v61 = vadd.f32 %v523_v53, %v522_v48  ;;  %v511_v59 = vadd.f32 %v1682_v13, %v510_v47 }
 0x103   :  { %1685 = vtanh.f32 %v2727_v61  ;;  %v515_v56 = vsel %vm514_vm10, %v1682_v13, %v511_v59 }
 0x104   :  { %v520_v60 = vsel %vm517_vm11, %v519_v58, %v515_v56 }
 0x109   :  { %v1686_v62 = vpop.eup %1685 }
 0x10a   :  { %v526_v57 = vmul.f32 %v1686_v62, %v520_v60 }
 0x10c   :  { %548 = vmatmul.f32.vlgmr.msra.gmra.mxu0 %v526_v57  ;;  %568 = vmatmul.f32.vlgmr.msra.gmra.mxu1 %v526_v57 }
 0x10d   :  { %588 = vmatmul.f32.vlgmr.msra.gmra.mxu2 %v526_v57  ;;  %608 = vmatmul.f32.vlgmr.msra.gmra.mxu3 %v526_v57 }
 0x10e   :  { %836 = vmatpush.msra.mxu0 %v2116_v1  ;;  %856 = vmatpush.msra.mxu1 %v2121_v2  ;;  %v3634_v1 = vld [vmem:[#allocation3_spill] sm:$0xff]  ;;  %v3635_v2 = vld [vmem:[#allocation4_spill] sm:$0xff] }
 0x10f   :  { %876 = vmatpush.msra.mxu2 %v2131_v4  ;;  %896 = vmatpush.msra.mxu3 %v2126_v3  ;;  %v3636_v3 = vld [vmem:[#allocation5_spill] sm:$0xff]  ;;  %v3637_v4 = vld [vmem:[#allocation7_spill] sm:$0xff] }
 0x110   :  { %837 = vmatpush.msra.mxu0 %v2136_v5  ;;  %857 = vmatpush.msra.mxu1 %v2141_v6  ;;  %v3638_v5 = vld [vmem:[#allocation6_spill] sm:$0xff]  ;;  %v3639_v6 = vld [vmem:[#allocation8_spill] sm:$0xff] }
 0x111   :  { %877 = vmatpush.msra.mxu2 %v2153_v8  ;;  %897 = vmatpush.msra.mxu3 %v2148_v7  ;;  %v3640_v7 = vld [vmem:[#allocation9_spill] sm:$0xff]  ;;  %v3641_v8 = vld [vmem:[#allocation11_spill] sm:$0xff] }
 0x112   :  { %838 = vmatpush.msra.mxu0 %v2159_v9  ;;  %858 = vmatpush.msra.mxu1 %v2164_v10  ;;  %v3642_v9 = vld [vmem:[#allocation10_spill] sm:$0xff]  ;;  %v3643_v10 = vld [vmem:[#allocation12_spill] sm:$0xff] }
 0x113   :  { %878 = vmatpush.msra.mxu2 %v2177_v12  ;;  %898 = vmatpush.msra.mxu3 %v2172_v11  ;;  %v3644_v11 = vld [vmem:[#allocation13_spill] sm:$0xff]  ;;  %v3645_v12 = vld [vmem:[#allocation15_spill] sm:$0xff] }
 0x114   :  { %839 = vmatpush.msra.mxu0 %v2189_v14  ;;  %859 = vmatpush.msra.mxu1 %v2194_v15  ;;  %v3646_v14 = vld [vmem:[#allocation14_spill] sm:$0xff]  ;;  %v3647_v15 = vld [vmem:[#allocation16_spill] sm:$0xff] }
 0x115   :  { %879 = vmatpush.msra.mxu2 %v2206_v17  ;;  %899 = vmatpush.msra.mxu3 %v2201_v16  ;;  %v3648_v16 = vld [vmem:[#allocation17_spill] sm:$0xff]  ;;  %v3649_v17 = vld [vmem:[#allocation19_spill] sm:$0xff] }
 0x116   :  { %840 = vmatpush.msra.mxu0 %v2211_v18  ;;  %860 = vmatpush.msra.mxu1 %v2216_v19  ;;  %v3650_v18 = vld [vmem:[#allocation18_spill] sm:$0xff]  ;;  %v3651_v19 = vld [vmem:[#allocation20_spill] sm:$0xff] }
 0x117   :  { %880 = vmatpush.msra.mxu2 %v2228_v21  ;;  %900 = vmatpush.msra.mxu3 %v2223_v20  ;;  %v3652_v20 = vld [vmem:[#allocation21_spill] sm:$0xff]  ;;  %v3653_v21 = vld [vmem:[#allocation22_spill] sm:$0xff] }
 0x118   :  { %841 = vmatpush.msra.mxu0 %v2234_v22  ;;  %861 = vmatpush.msra.mxu1 %v2239_v23  ;;  %v3654_v22 = vld [vmem:[#allocation23_spill] sm:$0xff]  ;;  %v3655_v23 = vld [vmem:[#allocation24_spill] sm:$0xff] }
 0x119   :  { %881 = vmatpush.msra.mxu2 %v2252_v25  ;;  %901 = vmatpush.msra.mxu3 %v2247_v24  ;;  %v3656_v24 = vld [vmem:[#allocation25_spill] sm:$0xff]  ;;  %v3657_v25 = vld [vmem:[#allocation26_spill] sm:$0xff] }
 0x11a   :  { %842 = vmatpush.msra.mxu0 %v2264_v27  ;;  %862 = vmatpush.msra.mxu1 %v2269_v28  ;;  %v3658_v27 = vld [vmem:[#allocation27_spill] sm:$0xff] }
 0x11b   :  { %882 = vmatpush.msra.mxu2 %v2281_v30  ;;  %902 = vmatpush.msra.mxu3 %v2276_v29  ;;  %v3659_v30 = vld [vmem:[#allocation28_spill] sm:$0xff] }
 0x11c   :  { %843 = vmatpush.msra.mxu0 %v2286_v31  ;;  %863 = vmatpush.msra.mxu1 %v2291_v32  ;;  %v3660_v32 = vld [vmem:[#allocation29_spill] sm:$0xff] }
 0x11d   :  { %883 = vmatpush.msra.mxu2 %v2303_v34  ;;  %903 = vmatpush.msra.mxu3 %v2298_v33 }
 0x11e   :  { %844 = vmatpush.msra.mxu0 %v2309_v35  ;;  %864 = vmatpush.msra.mxu1 %v2314_v36 }
 0x11f   :  { %884 = vmatpush.msra.mxu2 %v2327_v38  ;;  %904 = vmatpush.msra.mxu3 %v2322_v37  ;;  %v3661_v37 = vld [vmem:[#allocation31_spill] sm:$0xff] }
 0x120   :  { %845 = vmatpush.msra.mxu0 %v2339_v40  ;;  %865 = vmatpush.msra.mxu1 %v2344_v41 }
 0x121   :  { %885 = vmatpush.msra.mxu2 %v2356_v43  ;;  %905 = vmatpush.msra.mxu3 %v3634_v1 }
 0x122   :  { %846 = vmatpush.msra.mxu0 %v3635_v2  ;;  %866 = vmatpush.msra.mxu1 %v3636_v3 }
 0x123   :  { %886 = vmatpush.msra.mxu2 %v3637_v4  ;;  %906 = vmatpush.msra.mxu3 %v3638_v5 }
 0x124   :  { %847 = vmatpush.msra.mxu0 %v3639_v6  ;;  %867 = vmatpush.msra.mxu1 %v3640_v7 }
 0x125   :  { %887 = vmatpush.msra.mxu2 %v3641_v8  ;;  %907 = vmatpush.msra.mxu3 %v3642_v9 }
 0x126   :  { %848 = vmatpush.msra.mxu0 %v3643_v10  ;;  %868 = vmatpush.msra.mxu1 %v3644_v11 }
 0x127   :  { %888 = vmatpush.msra.mxu2 %v3645_v12  ;;  %908 = vmatpush.msra.mxu3 %v3646_v14 }
 0x128   :  { %849 = vmatpush.msra.mxu0 %v3647_v15  ;;  %869 = vmatpush.msra.mxu1 %v3648_v16 }
 0x129   :  { %889 = vmatpush.msra.mxu2 %v3649_v17  ;;  %909 = vmatpush.msra.mxu3 %v3650_v18 }
 0x12a   :  { %850 = vmatpush.msra.mxu0 %v3651_v19  ;;  %870 = vmatpush.msra.mxu1 %v3652_v20 }
 0x12b   :  { %890 = vmatpush.msra.mxu2 %v3653_v21  ;;  %910 = vmatpush.msra.mxu3 %v3654_v22  ;;  %v2811_v21 = vld [vmem:[%s3485_s2 + $0x1e8] sm:$0xff]  ;;  %v2817_v22 = vld [vmem:[%s3485_s2 + $0x1f0] sm:$0xff] }
 0x12c   :  { %851 = vmatpush.msra.mxu0 %v3655_v23  ;;  %871 = vmatpush.msra.mxu1 %v3656_v24 }
 0x12d   :  { %891 = vmatpush.msra.mxu2 %v3657_v25  ;;  %911 = vmatpush.msra.mxu3 %v3658_v27 }
 0x189   :  { %v549_v28 = vpop.f32.mrf.mxu0  ;;  %v569_v29 = vpop.f32.mrf.mxu1 }
 0x18a   :  { %v612_v31 = vadd.f32 %v549_v28, %v3659_v30  ;;  %v613_v33 = vadd.f32 %v569_v29, %v3660_v32  ;;  %v2823_v28 = vld [vmem:[%s3485_s2 + $0x1f8] sm:$0xff]  ;;  %v2829_v29 = vld [vmem:[%s3485_s2 + $0x1c0] sm:$0xff]  ;;  %v2835_v30 = vld [vmem:[%s3485_s2 + $0x1c8] sm:$0xff] }
 0x18b   :  { %v2847_v32 = vld [vmem:[%s3485_s2 + $0x1d8] sm:$0xff] }
 0x18c   :  { %v1649_v34 = vmul.f32 -1.442695, %v612_v31  ;;  %v1650_v35 = vmul.f32 -1.442695, %v613_v33  ;;  %v2841_v31 = vld [vmem:[%s3485_s2 + $0x1d0] sm:$0xff]  ;;  %v2853_v33 = vld [vmem:[%s3485_s2 + $0x1a0] sm:$0xff] }
 0x18e   :  { %1687 = vpow2.f32 %v1649_v34  ;;  %v2859_v34 = vld [vmem:[%s3485_s2 + $0x1a8] sm:$0xff] }
 0x18f   :  { %1689 = vpow2.f32 %v1650_v35  ;;  %v2865_v35 = vld [vmem:[%s3485_s2 + $0x1b0] sm:$0xff] }
 0x190   :  { %v609_v36 = vpop.f32.mrf.mxu3  ;;  %v589_v55 = vpop.f32.mrf.mxu2 }
 0x191   :  { %v615_v38 = vadd.f32 %v609_v36, %v3661_v37  ;;  %v614_v0 = vadd.f32 %v589_v55, %v3662_v50  ;;  %v2871_v36 = vld [vmem:[%s3485_s2 + $0x1b8] sm:$0xff]  ;;  %v2877_v37 = vld [vmem:[%s3485_s2 + $0x180] sm:$0xff] }
 0x192   :  { %v2919_v55 = vld [vmem:[%s3485_s2 + $0x178] sm:$0xff] }
 0x193   :  { %v1651_v40 = vmul.f32 -1.442695, %v615_v38  ;;  %v2883_v38 = vld [vmem:[%s3485_s2 + $0x188] sm:$0xff]  ;;  %v2943_v50 = vld [vmem:[%s3485_s2 + $0x158] sm:$0xff] }
 0x194   :  { %v1688_v41 = vpop.eup %1687 }
 0x195   :  { %v1690_v42 = vpop.eup %1689  ;;  %v619_v43 = vadd.f32 1.0, %v1688_v41  ;;  %1691 = vpow2.f32 %v1651_v40  ;;  %v2889_v40 = vld [vmem:[%s3485_s2 + $0x190] sm:$0xff]  ;;  %v2895_v41 = vld [vmem:[%s3485_s2 + $0x198] sm:$0xff] }
 0x196   :  { %v638_v47 = vadd.f32 1.0, %v1690_v42  ;;  %v2901_v42 = vld [vmem:[%s3485_s2 + $0x160] sm:$0xff] }
 0x197   :  { %1693 = vrcp.f32 %v619_v43  ;;  %v631_v26 = vand.u32 2147483648, %v619_v43  ;;  %v629_v48 = vand.u32 2147483647, %v619_v43  ;;  %vm625_vm14 = vweird.f32 %v619_v43 }
 0x198   :  { %1695 = vrcp.f32 %v638_v47  ;;  %v650_v39 = vand.u32 2147483648, %v638_v47  ;;  %v648_v54 = vand.u32 2147483647, %v638_v47  ;;  %vm644_vm15 = vweird.f32 %v638_v47 }
 0x199   :  { %v632_v62 = vor.u32 1.1754944e-38, %v631_v26  ;;  %vm630_vm2 = vcmp.eq.f32.partialorder %v629_v48, 8.507059e+37  ;;  %v2985_v26 = vld [vmem:[%s3485_s2 + $0x110] sm:$0xff]  ;;  %v3003_v48 = vld [vmem:[%s3485_s2 + $0xe8] sm:$0xff] }
 0x19a   :  { %v651_v1 = vor.u32 1.1754944e-38, %v650_v39  ;;  %vm649_vm3 = vcmp.eq.f32.partialorder %v648_v54, 8.507059e+37  ;;  %v2991_v39 = vld [vmem:[%s3485_s2 + $0x118] sm:$0xff] }
 0x19b   :  { %v1692_v46 = vpop.eup %1691  ;;  %v3015_v54 = vld [vmem:[%s3485_s2 + $0xf8] sm:$0xff] }
 0x19c   :  { %v658_v13 = vadd.f32 1.0, %v1692_v46  ;;  %v2925_v46 = vld [vmem:[%s3485_s2 + $0x140] sm:$0xff] }
 0x19d   :  { %v1694_v52 = vpop.eup %1693 }
 0x19e   :  { %v1696_v49 = vpop.eup %1695  ;;  %v621_v45 = vmul.f32 %v1694_v52, %v619_v43  ;;  %1697 = vrcp.f32 %v658_v13  ;;  %vm626_vm12 = vweird.f32 %v1694_v52  ;;  %v670_v14 = vand.u32 2147483648, %v658_v13  ;;  %v2907_v43 = vld [vmem:[%s3485_s2 + $0x168] sm:$0xff] }
 0x19f   :  { %v640_v44 = vmul.f32 %v1696_v49, %v638_v47  ;;  %1699 = vtanh.f32 %v614_v0  ;;  %vm645_vm13 = vweird.f32 %v1696_v49  ;;  %vm627_vm0 = vmor %vm625_vm14, %vm626_vm12  ;;  %vm664_vm5 = vweird.f32 %v658_v13  ;;  %v2913_v47 = vld [vmem:[%s3485_s2 + $0x170] sm:$0xff]  ;;  %v2949_v0 = vld [vmem:[%s3485_s2 + $0x120] sm:$0xff] }
 0x1a0   :  { %v622_v63 = vsub.f32 1.0, %v621_v45  ;;  %vm646_vm1 = vmor %vm644_vm15, %vm645_vm13  ;;  %v668_v15 = vand.u32 2147483647, %v658_v13  ;;  %v671_v17 = vor.u32 1.1754944e-38, %v670_v14  ;;  %v2961_v45 = vld [vmem:[%s3485_s2 + $0x130] sm:$0xff]  ;;  %v3117_v14 = vld [vmem:[%s3485_s2 + $0x40] sm:$0xff] }
 0x1a1   :  { %v641_v51 = vsub.f32 1.0, %v640_v44  ;;  %v2967_v44 = vld [vmem:[%s3485_s2 + $0x138] sm:$0xff]  ;;  %3677 = vst [vmem:[#allocation17_spill] sm:$0xff] %v3117_v14 }
 0x1a2   :  { %v623_v53 = vmul.f32 %v1694_v52, %v622_v63  ;;  %vm669_vm7 = vcmp.eq.f32.partialorder %v668_v15, 8.507059e+37  ;;  %v2973_v63 = vld [vmem:[%s3485_s2 + $0x100] sm:$0xff]  ;;  %v3123_v15 = vld [vmem:[%s3485_s2 + $0x48] sm:$0xff] }
 0x1a3   :  { %v642_v59 = vmul.f32 %v1696_v49, %v641_v51  ;;  %v2979_v51 = vld [vmem:[%s3485_s2 + $0x108] sm:$0xff]  ;;  %3678 = vst [vmem:[#allocation19_spill] sm:$0xff] %v3123_v15 }
 0x1a4   :  { %v1698_v56 = vpop.eup %1697  ;;  %v624_v58 = vadd.f32 %v1694_v52, %v623_v53  ;;  %v2997_v53 = vld [vmem:[%s3485_s2 + $0xe0] sm:$0xff] }
 0x1a5   :  { %v643_v60 = vadd.f32 %v1696_v49, %v642_v59  ;;  %v660_v57 = vmul.f32 %v1698_v56, %v658_v13  ;;  %v1700_v3 = vpop.eup %1699  ;;  %vm665_vm4 = vweird.f32 %v1698_v56  ;;  %v2931_v13 = vld [vmem:[%s3485_s2 + $0x148] sm:$0xff]  ;;  %v3009_v59 = vld [vmem:[%s3485_s2 + $0xf0] sm:$0xff] }
 0x1a6   :  { %v628_v2 = vsel %vm627_vm0, %v1694_v52, %v624_v58  ;;  %vm666_vm6 = vmor %vm664_vm5, %vm665_vm4  ;;  %v2937_v52 = vld [vmem:[%s3485_s2 + $0x150] sm:$0xff]  ;;  %v3027_v58 = vld [vmem:[%s3485_s2 + $0xc8] sm:$0xff] }
 0x1a7   :  { %v633_v4 = vsel %vm630_vm2, %v632_v62, %v628_v2  ;;  %v647_v5 = vsel %vm646_vm1, %v1696_v49, %v643_v60  ;;  %v661_v6 = vsub.f32 1.0, %v660_v57  ;;  %v2955_v49 = vld [vmem:[%s3485_s2 + $0x128] sm:$0xff]  ;;  %v3033_v62 = vld [vmem:[%s3485_s2 + $0xd0] sm:$0xff]  ;;  %v3039_v60 = vld [vmem:[%s3485_s2 + $0xd8] sm:$0xff] }
 0x1a8   :  { %v652_v7 = vsel %vm649_vm3, %v651_v1, %v647_v5  ;;  %v675_v8 = vmul.f32 %v1700_v3, %v633_v4  ;;  %3663 = vst [vmem:[#allocation3_spill] sm:$0xff] %v3033_v62  ;;  %v3045_v57 = vld [vmem:[%s3485_s2 + $0xa0] sm:$0xff]  ;;  %v3051_v1 = vld [vmem:[%s3485_s2 + $0xa8] sm:$0xff]  ;;  %v3057_v2 = vld [vmem:[%s3485_s2 + $0xb0] sm:$0xff] }
 0x1a9   :  { %v674_v9 = vmul.f32 %v652_v7, %v2727_v61  ;;  %v662_v10 = vmul.f32 %v1698_v56, %v661_v6  ;;  %v2805_v61 = vld [vmem:[%s3485_s2 + $0x1e0] sm:$0xff]  ;;  %3664 = vst [vmem:[#allocation4_spill] sm:$0xff] %v3039_v60  ;;  %v3063_v3 = vld [vmem:[%s3485_s2 + $0xb8] sm:$0xff]  ;;  %v3075_v5 = vld [vmem:[%s3485_s2 + $0x88] sm:$0xff] }
 0x1aa   :  { %3665 = vst [vmem:[#allocation5_spill] sm:$0xff] %v3045_v57  ;;  %v3069_v4 = vld [vmem:[%s3485_s2 + $0x80] sm:$0xff]  ;;  %v3081_v6 = vld [vmem:[%s3485_s2 + $0x90] sm:$0xff]  ;;  %v3087_v7 = vld [vmem:[%s3485_s2 + $0x98] sm:$0xff] }
 0x1ab   :  { %v2799_v11 = vadd.f32 %v675_v8, %v674_v9  ;;  %v663_v12 = vadd.f32 %v1698_v56, %v662_v10  ;;  %3666 = vst [vmem:[#allocation7_spill] sm:$0xff] %v3051_v1  ;;  %v3093_v8 = vld [vmem:[%s3485_s2 + $0x60] sm:$0xff]  ;;  %v3099_v9 = vld [vmem:[%s3485_s2 + $0x68] sm:$0xff]  ;;  %v3105_v10 = vld [vmem:[%s3485_s2 + $0x70] sm:$0xff] }
 0x1ac   :  { %3667 = vst [vmem:[#allocation6_spill] sm:$0xff] %v3057_v2 }
 0x1ad   :  { %1701 = vtanh.f32 %v2799_v11  ;;  %v667_v16 = vsel %vm666_vm6, %v1698_v56, %v663_v12  ;;  %v3021_v56 = vld [vmem:[%s3485_s2 + $0xc0] sm:$0xff]  ;;  %3668 = vst [vmem:[#allocation8_spill] sm:$0xff] %v3063_v3  ;;  %v3111_v12 = vld [vmem:[%s3485_s2 + $0x78] sm:$0xff] }
 0x1ae   :  { %v672_v19 = vsel %vm669_vm7, %v671_v17, %v667_v16  ;;  %3669 = vst [vmem:[#allocation9_spill] sm:$0xff] %v3069_v4  ;;  %v3129_v16 = vld [vmem:[%s3485_s2 + $0x50] sm:$0xff]  ;;  %v3135_v17 = vld [vmem:[%s3485_s2 + $0x58] sm:$0xff] }
 0x1af   :  { %3670 = vst [vmem:[#allocation11_spill] sm:$0xff] %v3075_v5 }
 0x1b0   :  { %3671 = vst [vmem:[#allocation10_spill] sm:$0xff] %v3081_v6 }
 0x1b1   :  { %3672 = vst [vmem:[#allocation12_spill] sm:$0xff] %v3087_v7 }
 0x1b2   :  { %3673 = vst [vmem:[#allocation13_spill] sm:$0xff] %v3093_v8 }
 0x1b3   :  { %v1702_v18 = vpop.eup %1701  ;;  %3674 = vst [vmem:[#allocation15_spill] sm:$0xff] %v3099_v9 }
 0x1b4   :  { %v678_v20 = vmul.f32 %v1702_v18, %v672_v19  ;;  %3675 = vst [vmem:[#allocation14_spill] sm:$0xff] %v3105_v10  ;;  %v3141_v18 = vld [vmem:[%s3485_s2 + $0x20] sm:$0xff]  ;;  %v3147_v19 = vld [vmem:[%s3485_s2 + $0x28] sm:$0xff] }
 0x1b5   :  { %3676 = vst [vmem:[#allocation16_spill] sm:$0xff] %v3111_v12 }
 0x1b6   :  { %700 = vmatmul.f32.vlgmr.msrb.gmra.mxu0 %v678_v20  ;;  %720 = vmatmul.f32.vlgmr.msrb.gmra.mxu1 %v678_v20  ;;  %3679 = vst [vmem:[#allocation18_spill] sm:$0xff] %v3129_v16 }
 0x1b7   :  { %740 = vmatmul.f32.vlgmr.msrb.gmra.mxu2 %v678_v20  ;;  %760 = vmatmul.f32.vlgmr.msrb.gmra.mxu3 %v678_v20  ;;  %3680 = vst [vmem:[#allocation20_spill] sm:$0xff] %v3135_v17  ;;  %v3153_v20 = vld [vmem:[%s3485_s2 + $0x30] sm:$0xff] }
 0x1b8   :  { %988 = vmatpush.msrb.mxu0 %v2805_v61  ;;  %1008 = vmatpush.msrb.mxu1 %v2811_v21  ;;  %3681 = vst [vmem:[#allocation21_spill] sm:$0xff] %v3141_v18 }
 0x1b9   :  { %1028 = vmatpush.msrb.mxu2 %v2817_v22  ;;  %1048 = vmatpush.msrb.mxu3 %v2823_v28  ;;  %3682 = vst [vmem:[#allocation22_spill] sm:$0xff] %v3147_v19 }
 0x1ba   :  { %989 = vmatpush.msrb.mxu0 %v2829_v29  ;;  %1009 = vmatpush.msrb.mxu1 %v2835_v30  ;;  %3683 = vst [vmem:[#allocation23_spill] sm:$0xff] %v3153_v20 }
 0x1bb   :  { %1029 = vmatpush.msrb.mxu2 %v2841_v31  ;;  %1049 = vmatpush.msrb.mxu3 %v2847_v32 }
 0x1bc   :  { %990 = vmatpush.msrb.mxu0 %v2853_v33  ;;  %1010 = vmatpush.msrb.mxu1 %v2859_v34 }
 0x1bd   :  { %1030 = vmatpush.msrb.mxu2 %v2865_v35  ;;  %1050 = vmatpush.msrb.mxu3 %v2871_v36 }
 0x1be   :  { %991 = vmatpush.msrb.mxu0 %v2877_v37  ;;  %1011 = vmatpush.msrb.mxu1 %v2883_v38 }
 0x1bf   :  { %1031 = vmatpush.msrb.mxu2 %v2889_v40  ;;  %1051 = vmatpush.msrb.mxu3 %v2895_v41 }
 0x1c0   :  { %992 = vmatpush.msrb.mxu0 %v2901_v42  ;;  %1012 = vmatpush.msrb.mxu1 %v2907_v43 }
 0x1c1   :  { %1032 = vmatpush.msrb.mxu2 %v2913_v47  ;;  %1052 = vmatpush.msrb.mxu3 %v2919_v55 }
 0x1c2   :  { %993 = vmatpush.msrb.mxu0 %v2925_v46  ;;  %1013 = vmatpush.msrb.mxu1 %v2931_v13 }
 0x1c3   :  { %1033 = vmatpush.msrb.mxu2 %v2937_v52  ;;  %1053 = vmatpush.msrb.mxu3 %v2943_v50 }
 0x1c4   :  { %994 = vmatpush.msrb.mxu0 %v2949_v0  ;;  %1014 = vmatpush.msrb.mxu1 %v2955_v49 }
 0x1c5   :  { %1034 = vmatpush.msrb.mxu2 %v2961_v45  ;;  %1054 = vmatpush.msrb.mxu3 %v2967_v44 }
 0x1c6   :  { %995 = vmatpush.msrb.mxu0 %v2973_v63  ;;  %1015 = vmatpush.msrb.mxu1 %v2979_v51 }
 0x1c7   :  { %1035 = vmatpush.msrb.mxu2 %v2985_v26  ;;  %1055 = vmatpush.msrb.mxu3 %v2991_v39 }
 0x1c8   :  { %996 = vmatpush.msrb.mxu0 %v2997_v53  ;;  %1016 = vmatpush.msrb.mxu1 %v3003_v48 }
 0x1c9   :  { %1036 = vmatpush.msrb.mxu2 %v3009_v59  ;;  %1056 = vmatpush.msrb.mxu3 %v3015_v54 }
 0x1ca   :  { %997 = vmatpush.msrb.mxu0 %v3021_v56  ;;  %1017 = vmatpush.msrb.mxu1 %v3027_v58 }
 0x1cb   :  { %1037 = vmatpush.msrb.mxu2 %v3033_v62  ;;  %1057 = vmatpush.msrb.mxu3 %v3039_v60 }
 0x1cc   :  { %998 = vmatpush.msrb.mxu0 %v3045_v57  ;;  %1018 = vmatpush.msrb.mxu1 %v3051_v1 }
 0x1cd   :  { %1038 = vmatpush.msrb.mxu2 %v3057_v2  ;;  %1058 = vmatpush.msrb.mxu3 %v3063_v3 }
 0x1ce   :  { %999 = vmatpush.msrb.mxu0 %v3069_v4  ;;  %1019 = vmatpush.msrb.mxu1 %v3075_v5 }
 0x1cf   :  { %1039 = vmatpush.msrb.mxu2 %v3081_v6  ;;  %1059 = vmatpush.msrb.mxu3 %v3087_v7 }
 0x1d0   :  { %1000 = vmatpush.msrb.mxu0 %v3093_v8  ;;  %1020 = vmatpush.msrb.mxu1 %v3099_v9 }
 0x1d1   :  { %1040 = vmatpush.msrb.mxu2 %v3105_v10  ;;  %1060 = vmatpush.msrb.mxu3 %v3111_v12 }
 0x1d2   :  { %1001 = vmatpush.msrb.mxu0 %v3117_v14  ;;  %1021 = vmatpush.msrb.mxu1 %v3123_v15 }
 0x1d3   :  { %1041 = vmatpush.msrb.mxu2 %v3129_v16  ;;  %1061 = vmatpush.msrb.mxu3 %v3135_v17  ;;  %v3159_v17 = vld [vmem:[%s3485_s2 + $0x38] sm:$0xff]  ;;  %v3685_v16 = vld [vmem:[#allocation32_spill] sm:$0xff] }
 0x1d4   :  { %1002 = vmatpush.msrb.mxu0 %v3141_v18  ;;  %1022 = vmatpush.msrb.mxu1 %v3147_v19  ;;  %3684 = vst [vmem:[#allocation24_spill] sm:$0xff] %v3159_v17 }
 0x1d5   :  { %1042 = vmatpush.msrb.mxu2 %v3153_v20  ;;  %1062 = vmatpush.msrb.mxu3 %v3159_v17  ;;  %v3686_v20 = vld [vmem:[#allocation33_spill] sm:$0xff]  ;;  %v3687_v17 = vld [vmem:[#allocation35_spill] sm:$0xff] }
 0x1d6   :  { %1003 = vmatpush.msrb.mxu0 %v3655_v23  ;;  %1023 = vmatpush.msrb.mxu1 %v3656_v24 }
 0x1d7   :  { %1043 = vmatpush.msrb.mxu2 %v3657_v25  ;;  %1063 = vmatpush.msrb.mxu3 %v3658_v27 }
 0x233   :  { %v701_v19 = vpop.f32.mrf.mxu0  ;;  %v721_v18 = vpop.f32.mrf.mxu1 }
 0x234   :  { %v764_v15 = vadd.f32 %v701_v19, %v3685_v16  ;;  %v765_v14 = vadd.f32 %v721_v18, %v3686_v20  ;;  %v3688_v18 = vld [vmem:[#allocation34_spill] sm:$0xff] }
 0x236   :  { %v1652_v12 = vmul.f32 -1.442695, %v764_v15  ;;  %v1653_v10 = vmul.f32 -1.442695, %v765_v14 }
 0x238   :  { %1703 = vpow2.f32 %v1652_v12 }
 0x239   :  { %1705 = vpow2.f32 %v1653_v10 }
 0x23a   :  { %v761_v9 = vpop.f32.mrf.mxu3  ;;  %v741_v27 = vpop.f32.mrf.mxu2 }
 0x23b   :  { %v767_v8 = vadd.f32 %v761_v9, %v3687_v17  ;;  %v766_v15 = vadd.f32 %v741_v27, %v3688_v18 }
 0x23d   :  { %v1654_v23 = vmul.f32 -1.442695, %v767_v8 }
 0x23e   :  { %v1704_v7 = vpop.eup %1703 }
 0x23f   :  { %v1706_v24 = vpop.eup %1705  ;;  %v771_v6 = vadd.f32 1.0, %v1704_v7  ;;  %1707 = vpow2.f32 %v1654_v23 }
 0x240   :  { %v790_v25 = vadd.f32 1.0, %v1706_v24 }
 0x241   :  { %1709 = vrcp.f32 %v771_v6  ;;  %v783_v8 = vand.u32 2147483648, %v771_v6  ;;  %v781_v23 = vand.u32 2147483647, %v771_v6  ;;  %vm777_vm10 = vweird.f32 %v771_v6 }
 0x242   :  { %1711 = vrcp.f32 %v790_v25  ;;  %v802_v17 = vand.u32 2147483648, %v790_v25  ;;  %v800_v4 = vand.u32 2147483647, %v790_v25  ;;  %vm796_vm11 = vweird.f32 %v790_v25 }
 0x243   :  { %v784_v27 = vor.u32 1.1754944e-38, %v783_v8  ;;  %vm782_vm14 = vcmp.eq.f32.partialorder %v781_v23, 8.507059e+37 }
 0x244   :  { %vm801_vm15 = vcmp.eq.f32.partialorder %v800_v4, 8.507059e+37 }
 0x245   :  { %v1708_v5 = vpop.eup %1707 }
 0x246   :  { %v810_v16 = vadd.f32 1.0, %v1708_v5 }
 0x247   :  { %v1710_v19 = vpop.eup %1709 }
 0x248   :  { %v1712_v14 = vpop.eup %1711  ;;  %v773_v12 = vmul.f32 %v1710_v19, %v771_v6  ;;  %1713 = vrcp.f32 %v810_v16  ;;  %vm778_vm8 = vweird.f32 %v1710_v19  ;;  %v822_v8 = vand.u32 2147483648, %v810_v16 }
 0x249   :  { %v792_v10 = vmul.f32 %v1712_v14, %v790_v25  ;;  %1715 = vtanh.f32 %v766_v15  ;;  %vm797_vm9 = vweird.f32 %v1712_v14  ;;  %vm779_vm12 = vmor %vm777_vm10, %vm778_vm8  ;;  %vm816_vm1 = vweird.f32 %v810_v16 }
 0x24a   :  { %v774_v20 = vsub.f32 1.0, %v773_v12  ;;  %vm798_vm13 = vmor %vm796_vm11, %vm797_vm9  ;;  %v803_v12 = vor.u32 1.1754944e-38, %v802_v17  ;;  %v823_v23 = vor.u32 1.1754944e-38, %v822_v8  ;;  %v3707_v8 = vld [vmem:[#allocation21_spill] sm:$0xff] }
 0x24b   :  { %v793_v9 = vsub.f32 1.0, %v792_v10 }
 0x24c   :  { %v775_v7 = vmul.f32 %v1710_v19, %v774_v20 }
 0x24d   :  { %v794_v24 = vmul.f32 %v1712_v14, %v793_v9 }
 0x24e   :  { %v1714_v3 = vpop.eup %1713  ;;  %v776_v5 = vadd.f32 %v1710_v19, %v775_v7 }
 0x24f   :  { %v795_v18 = vadd.f32 %v1712_v14, %v794_v24  ;;  %v812_v2 = vmul.f32 %v1714_v3, %v810_v16  ;;  %v1716_v15 = vpop.eup %1715  ;;  %vm817_vm0 = vweird.f32 %v1714_v3  ;;  %v3696_v24 = vld [vmem:[#allocation11_spill] sm:$0xff] }
 0x250   :  { %v780_v10 = vsel %vm779_vm12, %v1710_v19, %v776_v5  ;;  %v820_v19 = vand.u32 2147483647, %v810_v16  ;;  %vm818_vm2 = vmor %vm816_vm1, %vm817_vm0  ;;  %v3695_v16 = vld [vmem:[#allocation9_spill] sm:$0xff]  ;;  %v3697_v5 = vld [vmem:[#allocation10_spill] sm:$0xff] }
 0x251   :  { %v785_v1 = vsel %vm782_vm14, %v784_v27, %v780_v10  ;;  %v799_v20 = vsel %vm798_vm13, %v1712_v14, %v795_v18  ;;  %v813_v57 = vsub.f32 1.0, %v812_v2  ;;  %v3698_v27 = vld [vmem:[#allocation12_spill] sm:$0xff]  ;;  %v3699_v18 = vld [vmem:[#allocation13_spill] sm:$0xff]  ;;  %v3701_v10 = vld [vmem:[#allocation14_spill] sm:$0xff] }
 0x252   :  { %v804_v9 = vsel %vm801_vm15, %v803_v12, %v799_v20  ;;  %v827_v60 = vmul.f32 %v1716_v15, %v785_v1  ;;  %vm821_vm3 = vcmp.eq.f32.partialorder %v820_v19, 8.507059e+37  ;;  %v3693_v1 = vld [vmem:[#allocation6_spill] sm:$0xff]  ;;  %v3700_v12 = vld [vmem:[#allocation15_spill] sm:$0xff]  ;;  %v3702_v15 = vld [vmem:[#allocation16_spill] sm:$0xff] }
 0x253   :  { %v826_v62 = vmul.f32 %v804_v9, %v2799_v11  ;;  %v814_v7 = vmul.f32 %v1714_v3, %v813_v57  ;;  %v3689_v11 = vld [vmem:[#allocation3_spill] sm:$0xff]  ;;  %v3703_v20 = vld [vmem:[#allocation17_spill] sm:$0xff]  ;;  %v3708_v19 = vld [vmem:[#allocation22_spill] sm:$0xff] }
 0x254   :  { %v3692_v57 = vld [vmem:[#allocation7_spill] sm:$0xff] }
 0x255   :  { %v3171_v6 = vadd.f32 %v827_v60, %v826_v62  ;;  %v815_v25 = vadd.f32 %v1714_v3, %v814_v7  ;;  %v3690_v62 = vld [vmem:[#allocation4_spill] sm:$0xff]  ;;  %v3691_v60 = vld [vmem:[#allocation5_spill] sm:$0xff]  ;;  %v3704_v9 = vld [vmem:[#allocation19_spill] sm:$0xff] }
 0x256   :  { %v3705_v7 = vld [vmem:[#allocation18_spill] sm:$0xff] }
 0x257   :  { %1717 = vtanh.f32 %v3171_v6  ;;  %v819_v17 = vsel %vm818_vm2, %v1714_v3, %v815_v25  ;;  %v3694_v3 = vld [vmem:[#allocation8_spill] sm:$0xff] }
 0x258   :  { %v824_v2 = vsel %vm821_vm3, %v823_v23, %v819_v17  ;;  %v3706_v25 = vld [vmem:[#allocation20_spill] sm:$0xff]  ;;  %v3709_v17 = vld [vmem:[#allocation23_spill] sm:$0xff] }
 0x259   :  { %v3710_v23 = vld [vmem:[#allocation24_spill] sm:$0xff] }
 0x25d   :  { %v1718_v4 = vpop.eup %1717 }
 0x25e   :  { %v830_v14 = vmul.f32 %v1718_v4, %v824_v2  ;;  %v3237_v4 = vld [vmem:[%s3485_s2] sm:$0xff]  ;;  %v3243_v2 = vld [vmem:[%s3485_s2 + $0x8] sm:$0xff] }
 0x25f   :  { %3711 = vst [vmem:[#allocation25_spill] sm:$0xff] %v3237_v4 }
 0x260   :  { %852 = vmatmul.f32.vlgmr.msra.gmra.mxu0 %v830_v14  ;;  %872 = vmatmul.f32.vlgmr.msra.gmra.mxu1 %v830_v14  ;;  %3712 = vst [vmem:[#allocation26_spill] sm:$0xff] %v3243_v2 }
 0x261   :  { %892 = vmatmul.f32.vlgmr.msra.gmra.mxu2 %v830_v14  ;;  %912 = vmatmul.f32.vlgmr.msra.gmra.mxu3 %v830_v14  ;;  %v3249_v14 = vld [vmem:[%s3485_s2 + $0x10] sm:$0xff] }
 0x262   :  { %1140 = vmatpush.msra.mxu0 %v2805_v61  ;;  %1160 = vmatpush.msra.mxu1 %v2811_v21  ;;  %3713 = vst [vmem:[#allocation27_spill] sm:$0xff] %v3249_v14 }
 0x263   :  { %1180 = vmatpush.msra.mxu2 %v2817_v22  ;;  %1200 = vmatpush.msra.mxu3 %v2823_v28 }
 0x264   :  { %1141 = vmatpush.msra.mxu0 %v2829_v29  ;;  %1161 = vmatpush.msra.mxu1 %v2835_v30 }
 0x265   :  { %1181 = vmatpush.msra.mxu2 %v2841_v31  ;;  %1201 = vmatpush.msra.mxu3 %v2847_v32 }
 0x266   :  { %1142 = vmatpush.msra.mxu0 %v2853_v33  ;;  %1162 = vmatpush.msra.mxu1 %v2859_v34 }
 0x267   :  { %1182 = vmatpush.msra.mxu2 %v2865_v35  ;;  %1202 = vmatpush.msra.mxu3 %v2871_v36 }
 0x268   :  { %1143 = vmatpush.msra.mxu0 %v2877_v37  ;;  %1163 = vmatpush.msra.mxu1 %v2883_v38 }
 0x269   :  { %1183 = vmatpush.msra.mxu2 %v2889_v40  ;;  %1203 = vmatpush.msra.mxu3 %v2895_v41 }
 0x26a   :  { %1144 = vmatpush.msra.mxu0 %v2901_v42  ;;  %1164 = vmatpush.msra.mxu1 %v2907_v43 }
 0x26b   :  { %1184 = vmatpush.msra.mxu2 %v2913_v47  ;;  %1204 = vmatpush.msra.mxu3 %v2919_v55 }
 0x26c   :  { %1145 = vmatpush.msra.mxu0 %v2925_v46  ;;  %1165 = vmatpush.msra.mxu1 %v2931_v13 }
 0x26d   :  { %1185 = vmatpush.msra.mxu2 %v2937_v52  ;;  %1205 = vmatpush.msra.mxu3 %v2943_v50 }
 0x26e   :  { %1146 = vmatpush.msra.mxu0 %v2949_v0  ;;  %1166 = vmatpush.msra.mxu1 %v2955_v49 }
 0x26f   :  { %1186 = vmatpush.msra.mxu2 %v2961_v45  ;;  %1206 = vmatpush.msra.mxu3 %v2967_v44 }
 0x270   :  { %1147 = vmatpush.msra.mxu0 %v2973_v63  ;;  %1167 = vmatpush.msra.mxu1 %v2979_v51 }
 0x271   :  { %1187 = vmatpush.msra.mxu2 %v2985_v26  ;;  %1207 = vmatpush.msra.mxu3 %v2991_v39 }
 0x272   :  { %1148 = vmatpush.msra.mxu0 %v2997_v53  ;;  %1168 = vmatpush.msra.mxu1 %v3003_v48 }
 0x273   :  { %1188 = vmatpush.msra.mxu2 %v3009_v59  ;;  %1208 = vmatpush.msra.mxu3 %v3015_v54 }
 0x274   :  { %1149 = vmatpush.msra.mxu0 %v3021_v56  ;;  %1169 = vmatpush.msra.mxu1 %v3027_v58 }
 0x275   :  { %1189 = vmatpush.msra.mxu2 %v3689_v11  ;;  %1209 = vmatpush.msra.mxu3 %v3690_v62 }
 0x276   :  { %1150 = vmatpush.msra.mxu0 %v3691_v60  ;;  %1170 = vmatpush.msra.mxu1 %v3692_v57 }
 0x277   :  { %1190 = vmatpush.msra.mxu2 %v3693_v1  ;;  %1210 = vmatpush.msra.mxu3 %v3694_v3 }
 0x278   :  { %1151 = vmatpush.msra.mxu0 %v3695_v16  ;;  %1171 = vmatpush.msra.mxu1 %v3696_v24 }
 0x279   :  { %1191 = vmatpush.msra.mxu2 %v3697_v5  ;;  %1211 = vmatpush.msra.mxu3 %v3698_v27 }
 0x27a   :  { %1152 = vmatpush.msra.mxu0 %v3699_v18  ;;  %1172 = vmatpush.msra.mxu1 %v3700_v12 }
 0x27b   :  { %1192 = vmatpush.msra.mxu2 %v3701_v10  ;;  %1212 = vmatpush.msra.mxu3 %v3702_v15  ;;  %v3717_v15 = vld [vmem:[#allocation39_spill] sm:$0xff] }
 0x27c   :  { %1153 = vmatpush.msra.mxu0 %v3703_v20  ;;  %1173 = vmatpush.msra.mxu1 %v3704_v9 }
 0x27d   :  { %1193 = vmatpush.msra.mxu2 %v3705_v7  ;;  %1213 = vmatpush.msra.mxu3 %v3706_v25  ;;  %v3716_v25 = vld [vmem:[#allocation37_spill] sm:$0xff] }
 0x27e   :  { %1154 = vmatpush.msra.mxu0 %v3707_v8  ;;  %1174 = vmatpush.msra.mxu1 %v3708_v19  ;;  %v3715_v19 = vld [vmem:[#allocation36_spill] sm:$0xff] }
 0x27f   :  { %1194 = vmatpush.msra.mxu2 %v3709_v17  ;;  %1214 = vmatpush.msra.mxu3 %v3710_v23  ;;  %v3255_v23 = vld [vmem:[%s3485_s2 + $0x18] sm:$0xff] }
 0x280   :  { %1155 = vmatpush.msra.mxu0 %v3237_v4  ;;  %1175 = vmatpush.msra.mxu1 %v3243_v2  ;;  %3714 = vst [vmem:[#allocation28_spill] sm:$0xff] %v3255_v23 }
 0x281   :  { %1195 = vmatpush.msra.mxu2 %v3249_v14  ;;  %1215 = vmatpush.msra.mxu3 %v3255_v23 }
 0x2dd   :  { %v853_v4 = vpop.f32.mrf.mxu0  ;;  %v873_v17 = vpop.f32.mrf.mxu1 }
 0x2de   :  { %v916_v8 = vadd.f32 %v853_v4, %v3715_v19  ;;  %v917_v2 = vadd.f32 %v873_v17, %v3716_v25  ;;  %v3718_v25 = vld [vmem:[#allocation38_spill] sm:$0xff] }
 0x2e0   :  { %v1655_v7 = vmul.f32 -1.442695, %v916_v8  ;;  %v1656_v9 = vmul.f32 -1.442695, %v917_v2 }
 0x2e2   :  { %1719 = vpow2.f32 %v1655_v7 }
 0x2e3   :  { %1721 = vpow2.f32 %v1656_v9 }
 0x2e4   :  { %v913_v20 = vpop.f32.mrf.mxu3  ;;  %v893_v23 = vpop.f32.mrf.mxu2 }
 0x2e5   :  { %v919_v14 = vadd.f32 %v913_v20, %v3717_v15  ;;  %v918_v8 = vadd.f32 %v893_v23, %v3718_v25 }
 0x2e7   :  { %v1657_v10 = vmul.f32 -1.442695, %v919_v14 }
 0x2e8   :  { %v1720_v12 = vpop.eup %1719 }
 0x2e9   :  { %v1722_v18 = vpop.eup %1721  ;;  %v923_v27 = vadd.f32 1.0, %v1720_v12  ;;  %1723 = vpow2.f32 %v1657_v10 }
 0x2ea   :  { %v942_v5 = vadd.f32 1.0, %v1722_v18 }
 0x2eb   :  { %1725 = vrcp.f32 %v923_v27  ;;  %v935_v20 = vand.u32 2147483648, %v923_v27  ;;  %v933_v18 = vand.u32 2147483647, %v923_v27  ;;  %vm929_vm6 = vweird.f32 %v923_v27 }
 0x2ec   :  { %1727 = vrcp.f32 %v942_v5  ;;  %v954_v14 = vand.u32 2147483648, %v942_v5  ;;  %v952_v16 = vand.u32 2147483647, %v942_v5  ;;  %vm948_vm7 = vweird.f32 %v942_v5 }
 0x2ed   :  { %v936_v23 = vor.u32 1.1754944e-38, %v935_v20  ;;  %vm934_vm10 = vcmp.eq.f32.partialorder %v933_v18, 8.507059e+37 }
 0x2ee   :  { %vm953_vm11 = vcmp.eq.f32.partialorder %v952_v16, 8.507059e+37 }
 0x2ef   :  { %v1724_v24 = vpop.eup %1723 }
 0x2f0   :  { %v962_v19 = vadd.f32 1.0, %v1724_v24 }
 0x2f1   :  { %v1726_v4 = vpop.eup %1725 }
 0x2f2   :  { %v1728_v17 = vpop.eup %1727  ;;  %v925_v7 = vmul.f32 %v1726_v4, %v923_v27  ;;  %1729 = vrcp.f32 %v962_v19  ;;  %vm930_vm4 = vweird.f32 %v1726_v4  ;;  %v974_v20 = vand.u32 2147483648, %v962_v19 }
 0x2f3   :  { %v944_v9 = vmul.f32 %v1728_v17, %v942_v5  ;;  %1731 = vtanh.f32 %v918_v8  ;;  %vm949_vm5 = vweird.f32 %v1728_v17  ;;  %vm931_vm8 = vmor %vm929_vm6, %vm930_vm4  ;;  %vm968_vm13 = vweird.f32 %v962_v19 }
 0x2f4   :  { %v926_v2 = vsub.f32 1.0, %v925_v7  ;;  %vm950_vm9 = vmor %vm948_vm7, %vm949_vm5  ;;  %v955_v7 = vor.u32 1.1754944e-38, %v954_v14  ;;  %v975_v18 = vor.u32 1.1754944e-38, %v974_v20  ;;  %v3737_v20 = vld [vmem:[#allocation21_spill] sm:$0xff] }
 0x2f5   :  { %v945_v15 = vsub.f32 1.0, %v944_v9 }
 0x2f6   :  { %v927_v12 = vmul.f32 %v1726_v4, %v926_v2 }
 0x2f7   :  { %v946_v10 = vmul.f32 %v1728_v17, %v945_v15 }
 0x2f8   :  { %v1730_v3 = vpop.eup %1729  ;;  %v928_v24 = vadd.f32 %v1726_v4, %v927_v12 }
 0x2f9   :  { %v947_v25 = vadd.f32 %v1728_v17, %v946_v10  ;;  %v964_v1 = vmul.f32 %v1730_v3, %v962_v19  ;;  %v1732_v8 = vpop.eup %1731  ;;  %vm969_vm12 = vweird.f32 %v1730_v3  ;;  %v3726_v10 = vld [vmem:[#allocation11_spill] sm:$0xff] }
 0x2fa   :  { %v932_v9 = vsel %vm931_vm8, %v1726_v4, %v928_v24  ;;  %v972_v4 = vand.u32 2147483647, %v962_v19  ;;  %vm970_vm14 = vmor %vm968_vm13, %vm969_vm12  ;;  %v3725_v19 = vld [vmem:[#allocation9_spill] sm:$0xff]  ;;  %v3727_v24 = vld [vmem:[#allocation10_spill] sm:$0xff] }
 0x2fb   :  { %v937_v57 = vsel %vm934_vm10, %v936_v23, %v932_v9  ;;  %v951_v2 = vsel %vm950_vm9, %v1728_v17, %v947_v25  ;;  %v965_v60 = vsub.f32 1.0, %v964_v1  ;;  %v3728_v23 = vld [vmem:[#allocation12_spill] sm:$0xff]  ;;  %v3729_v25 = vld [vmem:[#allocation13_spill] sm:$0xff]  ;;  %v3731_v9 = vld [vmem:[#allocation14_spill] sm:$0xff] }
 0x2fc   :  { %v956_v15 = vsel %vm953_vm11, %v955_v7, %v951_v2  ;;  %v979_v62 = vmul.f32 %v1732_v8, %v937_v57  ;;  %vm973_vm15 = vcmp.eq.f32.partialorder %v972_v4, 8.507059e+37  ;;  %v3723_v57 = vld [vmem:[#allocation6_spill] sm:$0xff]  ;;  %v3730_v7 = vld [vmem:[#allocation15_spill] sm:$0xff]  ;;  %v3732_v8 = vld [vmem:[#allocation16_spill] sm:$0xff] }
 0x2fd   :  { %v978_v11 = vmul.f32 %v956_v15, %v3171_v6  ;;  %v966_v12 = vmul.f32 %v1730_v3, %v965_v60  ;;  %v3719_v6 = vld [vmem:[#allocation3_spill] sm:$0xff]  ;;  %v3733_v2 = vld [vmem:[#allocation17_spill] sm:$0xff]  ;;  %v3738_v4 = vld [vmem:[#allocation22_spill] sm:$0xff] }
 0x2fe   :  { %v3722_v60 = vld [vmem:[#allocation7_spill] sm:$0xff] }
 0x2ff   :  { %v3263_v27 = vadd.f32 %v979_v62, %v978_v11  ;;  %v967_v5 = vadd.f32 %v1730_v3, %v966_v12  ;;  %v3720_v11 = vld [vmem:[#allocation4_spill] sm:$0xff]  ;;  %v3721_v62 = vld [vmem:[#allocation5_spill] sm:$0xff]  ;;  %v3734_v15 = vld [vmem:[#allocation19_spill] sm:$0xff] }
 0x300   :  { %v3735_v12 = vld [vmem:[#allocation18_spill] sm:$0xff] }
 0x301   :  { %1733 = vtanh.f32 %v3263_v27  ;;  %v971_v14 = vsel %vm970_vm14, %v1730_v3, %v967_v5  ;;  %v3724_v3 = vld [vmem:[#allocation8_spill] sm:$0xff] }
 0x302   :  { %v976_v1 = vsel %vm973_vm15, %v975_v18, %v971_v14  ;;  %v3736_v5 = vld [vmem:[#allocation20_spill] sm:$0xff]  ;;  %v3739_v14 = vld [vmem:[#allocation23_spill] sm:$0xff] }
 0x303   :  { %v3740_v18 = vld [vmem:[#allocation24_spill] sm:$0xff] }
 0x307   :  { %v1734_v16 = vpop.eup %1733 }
 0x308   :  { %v982_v17 = vmul.f32 %v1734_v16, %v976_v1  ;;  %v3741_v16 = vld [vmem:[#allocation25_spill] sm:$0xff]  ;;  %v3742_v1 = vld [vmem:[#allocation26_spill] sm:$0xff] }
 0x30a   :  { %1004 = vmatmul.f32.vlgmr.msrb.gmra.mxu0 %v982_v17  ;;  %1024 = vmatmul.f32.vlgmr.msrb.gmra.mxu1 %v982_v17 }
 0x30b   :  { %1044 = vmatmul.f32.vlgmr.msrb.gmra.mxu2 %v982_v17  ;;  %1064 = vmatmul.f32.vlgmr.msrb.gmra.mxu3 %v982_v17  ;;  %v3743_v17 = vld [vmem:[#allocation27_spill] sm:$0xff] }
 0x30c   :  { %1292 = vmatpush.msrb.mxu0 %v2805_v61  ;;  %1312 = vmatpush.msrb.mxu1 %v2811_v21 }
 0x30d   :  { %1332 = vmatpush.msrb.mxu2 %v2817_v22  ;;  %1352 = vmatpush.msrb.mxu3 %v2823_v28 }
 0x30e   :  { %1293 = vmatpush.msrb.mxu0 %v2829_v29  ;;  %1313 = vmatpush.msrb.mxu1 %v2835_v30 }
 0x30f   :  { %1333 = vmatpush.msrb.mxu2 %v2841_v31  ;;  %1353 = vmatpush.msrb.mxu3 %v2847_v32 }
 0x310   :  { %1294 = vmatpush.msrb.mxu0 %v2853_v33  ;;  %1314 = vmatpush.msrb.mxu1 %v2859_v34 }
 0x311   :  { %1334 = vmatpush.msrb.mxu2 %v2865_v35  ;;  %1354 = vmatpush.msrb.mxu3 %v2871_v36 }
 0x312   :  { %1295 = vmatpush.msrb.mxu0 %v2877_v37  ;;  %1315 = vmatpush.msrb.mxu1 %v2883_v38 }
 0x313   :  { %1335 = vmatpush.msrb.mxu2 %v2889_v40  ;;  %1355 = vmatpush.msrb.mxu3 %v2895_v41 }
 0x314   :  { %1296 = vmatpush.msrb.mxu0 %v2901_v42  ;;  %1316 = vmatpush.msrb.mxu1 %v2907_v43 }
 0x315   :  { %1336 = vmatpush.msrb.mxu2 %v2913_v47  ;;  %1356 = vmatpush.msrb.mxu3 %v2919_v55 }
 0x316   :  { %1297 = vmatpush.msrb.mxu0 %v2925_v46  ;;  %1317 = vmatpush.msrb.mxu1 %v2931_v13 }
 0x317   :  { %1337 = vmatpush.msrb.mxu2 %v2937_v52  ;;  %1357 = vmatpush.msrb.mxu3 %v2943_v50 }
 0x318   :  { %1298 = vmatpush.msrb.mxu0 %v2949_v0  ;;  %1318 = vmatpush.msrb.mxu1 %v2955_v49 }
 0x319   :  { %1338 = vmatpush.msrb.mxu2 %v2961_v45  ;;  %1358 = vmatpush.msrb.mxu3 %v2967_v44 }
 0x31a   :  { %1299 = vmatpush.msrb.mxu0 %v2973_v63  ;;  %1319 = vmatpush.msrb.mxu1 %v2979_v51 }
 0x31b   :  { %1339 = vmatpush.msrb.mxu2 %v2985_v26  ;;  %1359 = vmatpush.msrb.mxu3 %v2991_v39 }
 0x31c   :  { %1300 = vmatpush.msrb.mxu0 %v2997_v53  ;;  %1320 = vmatpush.msrb.mxu1 %v3003_v48 }
 0x31d   :  { %1340 = vmatpush.msrb.mxu2 %v3009_v59  ;;  %1360 = vmatpush.msrb.mxu3 %v3015_v54 }
 0x31e   :  { %1301 = vmatpush.msrb.mxu0 %v3021_v56  ;;  %1321 = vmatpush.msrb.mxu1 %v3027_v58 }
 0x31f   :  { %1341 = vmatpush.msrb.mxu2 %v3719_v6  ;;  %1361 = vmatpush.msrb.mxu3 %v3720_v11 }
 0x320   :  { %1302 = vmatpush.msrb.mxu0 %v3721_v62  ;;  %1322 = vmatpush.msrb.mxu1 %v3722_v60 }
 0x321   :  { %1342 = vmatpush.msrb.mxu2 %v3723_v57  ;;  %1362 = vmatpush.msrb.mxu3 %v3724_v3 }
 0x322   :  { %1303 = vmatpush.msrb.mxu0 %v3725_v19  ;;  %1323 = vmatpush.msrb.mxu1 %v3726_v10 }
 0x323   :  { %1343 = vmatpush.msrb.mxu2 %v3727_v24  ;;  %1363 = vmatpush.msrb.mxu3 %v3728_v23 }
 0x324   :  { %1304 = vmatpush.msrb.mxu0 %v3729_v25  ;;  %1324 = vmatpush.msrb.mxu1 %v3730_v7 }
 0x325   :  { %1344 = vmatpush.msrb.mxu2 %v3731_v9  ;;  %1364 = vmatpush.msrb.mxu3 %v3732_v8  ;;  %v3745_v8 = vld [vmem:[#allocation40_spill] sm:$0xff]  ;;  %v3746_v9 = vld [vmem:[#allocation41_spill] sm:$0xff] }
 0x326   :  { %1305 = vmatpush.msrb.mxu0 %v3733_v2  ;;  %1325 = vmatpush.msrb.mxu1 %v3734_v15  ;;  %v3744_v2 = vld [vmem:[#allocation28_spill] sm:$0xff] }
 0x327   :  { %1345 = vmatpush.msrb.mxu2 %v3735_v12  ;;  %1365 = vmatpush.msrb.mxu3 %v3736_v5 }
 0x328   :  { %1306 = vmatpush.msrb.mxu0 %v3737_v20  ;;  %1326 = vmatpush.msrb.mxu1 %v3738_v4 }
 0x329   :  { %1346 = vmatpush.msrb.mxu2 %v3739_v14  ;;  %1366 = vmatpush.msrb.mxu3 %v3740_v18  ;;  %v3747_v18 = vld [vmem:[#allocation43_spill] sm:$0xff] }
 0x32a   :  { %1307 = vmatpush.msrb.mxu0 %v3741_v16  ;;  %1327 = vmatpush.msrb.mxu1 %v3742_v1 }
 0x32b   :  { %1347 = vmatpush.msrb.mxu2 %v3743_v17  ;;  %1367 = vmatpush.msrb.mxu3 %v3744_v2 }
 0x387   :  { %v1005_v15 = vpop.f32.mrf.mxu0  ;;  %v1025_v12 = vpop.f32.mrf.mxu1 }
 0x388   :  { %v1068_v5 = vadd.f32 %v1005_v15, %v3745_v8  ;;  %v1069_v20 = vadd.f32 %v1025_v12, %v3746_v9  ;;  %v3748_v9 = vld [vmem:[#allocation42_spill] sm:$0xff] }
 0x38a   :  { %v1658_v7 = vmul.f32 -1.442695, %v1068_v5  ;;  %v1659_v4 = vmul.f32 -1.442695, %v1069_v20 }
 0x38c   :  { %1735 = vpow2.f32 %v1658_v7 }
 0x38d   :  { %1737 = vpow2.f32 %v1659_v4 }
 0x38e   :  { %v1065_v14 = vpop.f32.mrf.mxu3  ;;  %v1045_v2 = vpop.f32.mrf.mxu2 }
 0x38f   :  { %v1071_v25 = vadd.f32 %v1065_v14, %v3747_v18  ;;  %v1070_v12 = vadd.f32 %v1045_v2, %v3748_v9 }
 0x391   :  { %v1660_v16 = vmul.f32 -1.442695, %v1071_v25 }
 0x392   :  { %v1736_v23 = vpop.eup %1735 }
 0x393   :  { %v1738_v1 = vpop.eup %1737  ;;  %v1075_v24 = vadd.f32 1.0, %v1736_v23  ;;  %1739 = vpow2.f32 %v1660_v16 }
 0x394   :  { %v1094_v17 = vadd.f32 1.0, %v1738_v1 }
 0x395   :  { %1741 = vrcp.f32 %v1075_v24  ;;  %v1087_v25 = vand.u32 2147483648, %v1075_v24  ;;  %v1085_v16 = vand.u32 2147483647, %v1075_v24  ;;  %vm1081_vm2 = vweird.f32 %v1075_v24 }
 0x396   :  { %1743 = vrcp.f32 %v1094_v17  ;;  %v1106_v18 = vand.u32 2147483648, %v1094_v17  ;;  %v1104_v19 = vand.u32 2147483647, %v1094_v17  ;;  %vm1100_vm3 = vweird.f32 %v1094_v17 }
 0x397   :  { %v1088_v2 = vor.u32 1.1754944e-38, %v1087_v25  ;;  %vm1086_vm6 = vcmp.eq.f32.partialorder %v1085_v16, 8.507059e+37 }
 0x398   :  { %vm1105_vm7 = vcmp.eq.f32.partialorder %v1104_v19, 8.507059e+37 }
 0x399   :  { %v1740_v10 = vpop.eup %1739 }
 0x39a   :  { %v1114_v8 = vadd.f32 1.0, %v1740_v10 }
 0x39b   :  { %v1742_v15 = vpop.eup %1741 }
 0x39c   :  { %v1744_v5 = vpop.eup %1743  ;;  %v1077_v7 = vmul.f32 %v1742_v15, %v1075_v24  ;;  %1745 = vrcp.f32 %v1114_v8  ;;  %vm1082_vm0 = vweird.f32 %v1742_v15  ;;  %v1126_v25 = vand.u32 2147483648, %v1114_v8 }
 0x39d   :  { %v1096_v20 = vmul.f32 %v1744_v5, %v1094_v17  ;;  %1747 = vtanh.f32 %v1070_v12  ;;  %vm1101_vm1 = vweird.f32 %v1744_v5  ;;  %vm1083_vm4 = vmor %vm1081_vm2, %vm1082_vm0  ;;  %vm1120_vm9 = vweird.f32 %v1114_v8 }
 0x39e   :  { %v1078_v4 = vsub.f32 1.0, %v1077_v7  ;;  %vm1102_vm5 = vmor %vm1100_vm3, %vm1101_vm1  ;;  %v1107_v7 = vor.u32 1.1754944e-38, %v1106_v18  ;;  %v1127_v16 = vor.u32 1.1754944e-38, %v1126_v25 }
 0x39f   :  { %v1097_v14 = vsub.f32 1.0, %v1096_v20 }
 0x3a0   :  { %v1079_v23 = vmul.f32 %v1742_v15, %v1078_v4 }
 0x3a1   :  { %v1098_v1 = vmul.f32 %v1744_v5, %v1097_v14 }
 0x3a2   :  { %v1746_v3 = vpop.eup %1745  ;;  %v1080_v10 = vadd.f32 %v1742_v15, %v1079_v23 }
 0x3a3   :  { %v1099_v9 = vadd.f32 %v1744_v5, %v1098_v1  ;;  %v1116_v57 = vmul.f32 %v1746_v3, %v1114_v8  ;;  %v1748_v12 = vpop.eup %1747  ;;  %vm1121_vm8 = vweird.f32 %v1746_v3 }
 0x3a4   :  { %v1084_v20 = vsel %vm1083_vm4, %v1742_v15, %v1080_v10  ;;  %v1124_v15 = vand.u32 2147483647, %v1114_v8  ;;  %vm1122_vm10 = vmor %vm1120_vm9, %vm1121_vm8  ;;  %v3778_v10 = vld [vmem:[#allocation46_spill] sm:$0xff] }
 0x3a5   :  { %v1089_v60 = vsel %vm1086_vm6, %v1088_v2, %v1084_v20  ;;  %v1103_v4 = vsel %vm1102_vm5, %v1744_v5, %v1099_v9  ;;  %v1117_v62 = vsub.f32 1.0, %v1116_v57 }
 0x3a6   :  { %v1108_v14 = vsel %vm1105_vm7, %v1107_v7, %v1103_v4  ;;  %v1131_v11 = vmul.f32 %v1748_v12, %v1089_v60  ;;  %vm1125_vm11 = vcmp.eq.f32.partialorder %v1124_v15, 8.507059e+37 }
 0x3a7   :  { %v1130_v6 = vmul.f32 %v1108_v14, %v3263_v27  ;;  %v1118_v23 = vmul.f32 %v1746_v3, %v1117_v62 }
 0x3a9   :  { %v3335_v24 = vadd.f32 %v1131_v11, %v1130_v6  ;;  %v1119_v17 = vadd.f32 %v1746_v3, %v1118_v23 }
 0x3ab   :  { %1749 = vtanh.f32 %v3335_v24  ;;  %v1123_v18 = vsel %vm1122_vm10, %v1746_v3, %v1119_v17 }
 0x3ac   :  { %v1128_v57 = vsel %vm1125_vm11, %v1127_v16, %v1123_v18 }
 0x3b1   :  { %v1750_v19 = vpop.eup %1749 }
 0x3b2   :  { %v1134_v5 = vmul.f32 %v1750_v19, %v1128_v57 }
 0x3b4   :  { %1156 = vmatmul.f32.vlgmr.msra.gmra.mxu0 %v1134_v5  ;;  %1176 = vmatmul.f32.vlgmr.msra.gmra.mxu1 %v1134_v5 }
 0x3b5   :  { %1196 = vmatmul.f32.vlgmr.msra.gmra.mxu2 %v1134_v5  ;;  %1216 = vmatmul.f32.vlgmr.msra.gmra.mxu3 %v1134_v5 }
 0x3b6   :  { %1444 = vmatpush.msra.mxu0 %v2805_v61  ;;  %1464 = vmatpush.msra.mxu1 %v2811_v21  ;;  %v3749_v61 = vld [vmem:[#allocation3_spill] sm:$0xff]  ;;  %v3750_v21 = vld [vmem:[#allocation4_spill] sm:$0xff] }
 0x3b7   :  { %1484 = vmatpush.msra.mxu2 %v2817_v22  ;;  %1504 = vmatpush.msra.mxu3 %v2823_v28  ;;  %v3751_v22 = vld [vmem:[#allocation5_spill] sm:$0xff]  ;;  %v3752_v28 = vld [vmem:[#allocation7_spill] sm:$0xff] }
 0x3b8   :  { %1445 = vmatpush.msra.mxu0 %v2829_v29  ;;  %1465 = vmatpush.msra.mxu1 %v2835_v30  ;;  %v3753_v29 = vld [vmem:[#allocation6_spill] sm:$0xff]  ;;  %v3754_v30 = vld [vmem:[#allocation8_spill] sm:$0xff] }
 0x3b9   :  { %1485 = vmatpush.msra.mxu2 %v2841_v31  ;;  %1505 = vmatpush.msra.mxu3 %v2847_v32  ;;  %v3755_v31 = vld [vmem:[#allocation9_spill] sm:$0xff]  ;;  %v3756_v32 = vld [vmem:[#allocation11_spill] sm:$0xff] }
 0x3ba   :  { %1446 = vmatpush.msra.mxu0 %v2853_v33  ;;  %1466 = vmatpush.msra.mxu1 %v2859_v34  ;;  %v3757_v33 = vld [vmem:[#allocation10_spill] sm:$0xff]  ;;  %v3758_v34 = vld [vmem:[#allocation12_spill] sm:$0xff] }
 0x3bb   :  { %1486 = vmatpush.msra.mxu2 %v2865_v35  ;;  %1506 = vmatpush.msra.mxu3 %v2871_v36  ;;  %v3759_v35 = vld [vmem:[#allocation13_spill] sm:$0xff]  ;;  %v3760_v36 = vld [vmem:[#allocation15_spill] sm:$0xff] }
 0x3bc   :  { %1447 = vmatpush.msra.mxu0 %v2877_v37  ;;  %1467 = vmatpush.msra.mxu1 %v2883_v38  ;;  %v3761_v37 = vld [vmem:[#allocation14_spill] sm:$0xff]  ;;  %v3762_v38 = vld [vmem:[#allocation16_spill] sm:$0xff] }
 0x3bd   :  { %1487 = vmatpush.msra.mxu2 %v2889_v40  ;;  %1507 = vmatpush.msra.mxu3 %v2895_v41  ;;  %v3763_v40 = vld [vmem:[#allocation17_spill] sm:$0xff]  ;;  %v3764_v41 = vld [vmem:[#allocation19_spill] sm:$0xff] }
 0x3be   :  { %1448 = vmatpush.msra.mxu0 %v2901_v42  ;;  %1468 = vmatpush.msra.mxu1 %v2907_v43  ;;  %v3765_v42 = vld [vmem:[#allocation18_spill] sm:$0xff]  ;;  %v3766_v43 = vld [vmem:[#allocation20_spill] sm:$0xff] }
 0x3bf   :  { %1488 = vmatpush.msra.mxu2 %v2913_v47  ;;  %1508 = vmatpush.msra.mxu3 %v2919_v55  ;;  %v3767_v47 = vld [vmem:[#allocation21_spill] sm:$0xff]  ;;  %v3768_v55 = vld [vmem:[#allocation22_spill] sm:$0xff] }
 0x3c0   :  { %1449 = vmatpush.msra.mxu0 %v2925_v46  ;;  %1469 = vmatpush.msra.mxu1 %v2931_v13  ;;  %v3769_v46 = vld [vmem:[#allocation23_spill] sm:$0xff]  ;;  %v3770_v13 = vld [vmem:[#allocation24_spill] sm:$0xff] }
 0x3c1   :  { %1489 = vmatpush.msra.mxu2 %v2937_v52  ;;  %1509 = vmatpush.msra.mxu3 %v2943_v50  ;;  %v3771_v52 = vld [vmem:[#allocation25_spill] sm:$0xff]  ;;  %v3772_v50 = vld [vmem:[#allocation26_spill] sm:$0xff] }
 0x3c2   :  { %1450 = vmatpush.msra.mxu0 %v2949_v0  ;;  %1470 = vmatpush.msra.mxu1 %v2955_v49  ;;  %v3773_v0 = vld [vmem:[#allocation27_spill] sm:$0xff]  ;;  %v3774_v49 = vld [vmem:[#allocation28_spill] sm:$0xff] }
 0x3c3   :  { %1490 = vmatpush.msra.mxu2 %v2961_v45  ;;  %1510 = vmatpush.msra.mxu3 %v2967_v44 }
 0x3c4   :  { %1451 = vmatpush.msra.mxu0 %v2973_v63  ;;  %1471 = vmatpush.msra.mxu1 %v2979_v51  ;;  %v3775_v63 = vld [vmem:[#allocation44_spill] sm:$0xff] }
 0x3c5   :  { %1491 = vmatpush.msra.mxu2 %v2985_v26  ;;  %1511 = vmatpush.msra.mxu3 %v2991_v39  ;;  %v3776_v26 = vld [vmem:[#allocation45_spill] sm:$0xff] }
 0x3c6   :  { %1452 = vmatpush.msra.mxu0 %v2997_v53  ;;  %1472 = vmatpush.msra.mxu1 %v3003_v48 }
 0x3c7   :  { %1492 = vmatpush.msra.mxu2 %v3009_v59  ;;  %1512 = vmatpush.msra.mxu3 %v3015_v54  ;;  %v3777_v54 = vld [vmem:[#allocation47_spill] sm:$0xff] }
 0x3c8   :  { %1453 = vmatpush.msra.mxu0 %v3021_v56  ;;  %1473 = vmatpush.msra.mxu1 %v3027_v58 }
 0x3c9   :  { %1493 = vmatpush.msra.mxu2 %v3749_v61  ;;  %1513 = vmatpush.msra.mxu3 %v3750_v21 }
 0x3ca   :  { %1454 = vmatpush.msra.mxu0 %v3751_v22  ;;  %1474 = vmatpush.msra.mxu1 %v3752_v28 }
 0x3cb   :  { %1494 = vmatpush.msra.mxu2 %v3753_v29  ;;  %1514 = vmatpush.msra.mxu3 %v3754_v30 }
 0x3cc   :  { %1455 = vmatpush.msra.mxu0 %v3755_v31  ;;  %1475 = vmatpush.msra.mxu1 %v3756_v32 }
 0x3cd   :  { %1495 = vmatpush.msra.mxu2 %v3757_v33  ;;  %1515 = vmatpush.msra.mxu3 %v3758_v34 }
 0x3ce   :  { %1456 = vmatpush.msra.mxu0 %v3759_v35  ;;  %1476 = vmatpush.msra.mxu1 %v3760_v36 }
 0x3cf   :  { %1496 = vmatpush.msra.mxu2 %v3761_v37  ;;  %1516 = vmatpush.msra.mxu3 %v3762_v38 }
 0x3d0   :  { %1457 = vmatpush.msra.mxu0 %v3763_v40  ;;  %1477 = vmatpush.msra.mxu1 %v3764_v41 }
 0x3d1   :  { %1497 = vmatpush.msra.mxu2 %v3765_v42  ;;  %1517 = vmatpush.msra.mxu3 %v3766_v43 }
 0x3d2   :  { %1458 = vmatpush.msra.mxu0 %v3767_v47  ;;  %1478 = vmatpush.msra.mxu1 %v3768_v55 }
 0x3d3   :  { %1498 = vmatpush.msra.mxu2 %v3769_v46  ;;  %1518 = vmatpush.msra.mxu3 %v3770_v13  ;;  %v3779_v13 = vld [vmem:[#allocation48_spill] sm:$0xff] }
 0x3d4   :  { %1459 = vmatpush.msra.mxu0 %v3771_v52  ;;  %1479 = vmatpush.msra.mxu1 %v3772_v50  ;;  %v3780_v50 = vld [vmem:[#allocation49_spill] sm:$0xff] }
 0x3d5   :  { %1499 = vmatpush.msra.mxu2 %v3773_v0  ;;  %1519 = vmatpush.msra.mxu3 %v3774_v49 }
 0x431   :  { %v1157_v45 = vpop.f32.mrf.mxu0  ;;  %v1177_v44 = vpop.f32.mrf.mxu1 }
 0x432   :  { %v1220_v51 = vadd.f32 %v1157_v45, %v3775_v63  ;;  %v1221_v39 = vadd.f32 %v1177_v44, %v3776_v26  ;;  %v3781_v63 = vld [vmem:[#allocation51_spill] sm:$0xff] }
 0x434   :  { %v1661_v53 = vmul.f32 -1.442695, %v1220_v51  ;;  %v1662_v48 = vmul.f32 -1.442695, %v1221_v39 }
 0x436   :  { %1751 = vpow2.f32 %v1661_v53 }
 0x437   :  { %1753 = vpow2.f32 %v1662_v48 }
 0x438   :  { %v1217_v59 = vpop.f32.mrf.mxu3  ;;  %v1197_v60 = vpop.f32.mrf.mxu2 }
 0x439   :  { %v1223_v56 = vadd.f32 %v1217_v59, %v3777_v54  ;;  %v1222_v2 = vadd.f32 %v1197_v60, %v3778_v10 }
 0x43b   :  { %v1663_v58 = vmul.f32 -1.442695, %v1223_v56 }
 0x43c   :  { %v1752_v27 = vpop.eup %1751 }
 0x43d   :  { %v1754_v6 = vpop.eup %1753  ;;  %v1227_v11 = vadd.f32 1.0, %v1752_v27  ;;  %1755 = vpow2.f32 %v1663_v58 }
 0x43e   :  { %v1246_v62 = vadd.f32 1.0, %v1754_v6  ;;  %v3782_v6 = vld [vmem:[#allocation50_spill] sm:$0xff] }
 0x43f   :  { %1757 = vrcp.f32 %v1227_v11  ;;  %v1239_v14 = vand.u32 2147483648, %v1227_v11  ;;  %v1237_v25 = vand.u32 2147483647, %v1227_v11  ;;  %vm1233_vm14 = vweird.f32 %v1227_v11 }
 0x440   :  { %1759 = vrcp.f32 %v1246_v62  ;;  %v1258_v23 = vand.u32 2147483648, %v1246_v62  ;;  %v1256_v18 = vand.u32 2147483647, %v1246_v62  ;;  %vm1252_vm15 = vweird.f32 %v1246_v62 }
 0x441   :  { %v1240_v57 = vor.u32 1.1754944e-38, %v1239_v14  ;;  %vm1238_vm2 = vcmp.eq.f32.partialorder %v1237_v25, 8.507059e+37 }
 0x442   :  { %v1259_v21 = vor.u32 1.1754944e-38, %v1258_v23  ;;  %vm1257_vm3 = vcmp.eq.f32.partialorder %v1256_v18, 8.507059e+37 }
 0x443   :  { %v1756_v3 = vpop.eup %1755 }
 0x444   :  { %v1266_v8 = vadd.f32 1.0, %v1756_v3 }
 0x445   :  { %v1758_v1 = vpop.eup %1757 }
 0x446   :  { %v1760_v9 = vpop.eup %1759  ;;  %v1229_v7 = vmul.f32 %v1758_v1, %v1227_v11  ;;  %1761 = vrcp.f32 %v1266_v8  ;;  %vm1234_vm12 = vweird.f32 %v1758_v1  ;;  %v1278_v38 = vand.u32 2147483648, %v1266_v8 }
 0x447   :  { %v1248_v20 = vmul.f32 %v1760_v9, %v1246_v62  ;;  %1763 = vtanh.f32 %v1222_v2  ;;  %vm1253_vm13 = vweird.f32 %v1760_v9  ;;  %vm1235_vm0 = vmor %vm1233_vm14, %vm1234_vm12  ;;  %vm1272_vm5 = vweird.f32 %v1266_v8 }
 0x448   :  { %v1230_v12 = vsub.f32 1.0, %v1229_v7  ;;  %vm1254_vm1 = vmor %vm1252_vm15, %vm1253_vm13  ;;  %v1276_v40 = vand.u32 2147483647, %v1266_v8  ;;  %v1279_v42 = vor.u32 1.1754944e-38, %v1278_v38 }
 0x449   :  { %v1249_v4 = vsub.f32 1.0, %v1248_v20 }
 0x44a   :  { %v1231_v17 = vmul.f32 %v1758_v1, %v1230_v12  ;;  %vm1277_vm7 = vcmp.eq.f32.partialorder %v1276_v40, 8.507059e+37  ;;  %v1607_v40 = vld [vmem:[%s3490_s4 + $0x70] sm:$0xff] }
 0x44b   :  { %v1250_v15 = vmul.f32 %v1760_v9, %v1249_v4 }
 0x44c   :  { %v1762_v16 = vpop.eup %1761  ;;  %v1232_v19 = vadd.f32 %v1758_v1, %v1231_v17 }
 0x44d   :  { %v1251_v5 = vadd.f32 %v1760_v9, %v1250_v15  ;;  %v1268_v61 = vmul.f32 %v1762_v16, %v1266_v8  ;;  %v1764_v28 = vpop.eup %1763  ;;  %vm1273_vm4 = vweird.f32 %v1762_v16 }
 0x44e   :  { %v1236_v22 = vsel %vm1235_vm0, %v1758_v1, %v1232_v19  ;;  %vm1274_vm6 = vmor %vm1272_vm5, %vm1273_vm4 }
 0x44f   :  { %v1241_v29 = vsel %vm1238_vm2, %v1240_v57, %v1236_v22  ;;  %v1255_v30 = vsel %vm1254_vm1, %v1760_v9, %v1251_v5  ;;  %v1269_v31 = vsub.f32 1.0, %v1268_v61 }
 0x450   :  { %v1260_v32 = vsel %vm1257_vm3, %v1259_v21, %v1255_v30  ;;  %v1283_v33 = vmul.f32 %v1764_v28, %v1241_v29 }
 0x451   :  { %v1282_v34 = vmul.f32 %v1260_v32, %v3335_v24  ;;  %v1270_v35 = vmul.f32 %v1762_v16, %v1269_v31 }
 0x453   :  { %v3407_v36 = vadd.f32 %v1283_v33, %v1282_v34  ;;  %v1271_v37 = vadd.f32 %v1762_v16, %v1270_v35 }
 0x455   :  { %1765 = vtanh.f32 %v3407_v36  ;;  %v1275_v41 = vsel %vm1274_vm6, %v1762_v16, %v1271_v37 }
 0x456   :  { %v1280_v47 = vsel %vm1277_vm7, %v1279_v42, %v1275_v41  ;;  %v1606_v41 = vld [vmem:[%s3490_s4 + $0x68] sm:$0xff]  ;;  %v1605_v42 = vld [vmem:[%s3490_s4 + $0x60] sm:$0xff] }
 0x45b   :  { %v1766_v43 = vpop.eup %1765 }
 0x45c   :  { %v1286_v55 = vmul.f32 %v1766_v43, %v1280_v47  ;;  %v1604_v43 = vld [vmem:[%s3490_s4 + $0x58] sm:$0xff]  ;;  %v1603_v47 = vld [vmem:[%s3490_s4 + $0x50] sm:$0xff] }
 0x45e   :  { %1308 = vmatmul.f32.vlgmr.msrb.gmra.mxu0 %v1286_v55  ;;  %1328 = vmatmul.f32.vlgmr.msrb.gmra.mxu1 %v1286_v55 }
 0x45f   :  { %1348 = vmatmul.f32.vlgmr.msrb.gmra.mxu2 %v1286_v55  ;;  %1368 = vmatmul.f32.vlgmr.msrb.gmra.mxu3 %v1286_v55  ;;  %v1602_v55 = vld [vmem:[%s3490_s4 + $0x48] sm:$0xff] }
 0x4db   :  { %v1309_v24 = vpop.f32.mrf.mxu0  ;;  %v1329_v46 = vpop.f32.mrf.mxu1 }
 0x4dc   :  { %v1372_v52 = vadd.f32 %v1309_v24, %v3779_v13  ;;  %v1373_v0 = vadd.f32 %v1329_v46, %v3780_v50  ;;  %v1601_v24 = vld [vmem:[%s3490_s4 + $0x40] sm:$0xff]  ;;  %v1600_v46 = vld [vmem:[%s3490_s4 + $0x38] sm:$0xff]  ;;  %v1599_v13 = vld [vmem:[%s3490_s4 + $0x30] sm:$0xff] }
 0x4de   :  { %v1664_v49 = vmul.f32 -1.442695, %v1372_v52  ;;  %v1665_v45 = vmul.f32 -1.442695, %v1373_v0  ;;  %v3783_v0 = vld [vmem:[#allocation52_spill] sm:$0xff] }
 0x4e0   :  { %1767 = vpow2.f32 %v1664_v49 }
 0x4e1   :  { %1769 = vpow2.f32 %v1665_v45  ;;  %v3784_v45 = vld [vmem:[#allocation53_spill] sm:$0xff] }
 0x4e2   :  { %v1369_v44 = vpop.f32.mrf.mxu3  ;;  %v1349_v54 = vpop.f32.mrf.mxu2 }
 0x4e3   :  { %v1375_v51 = vadd.f32 %v1369_v44, %v3781_v63  ;;  %v1374_v11 = vadd.f32 %v1349_v54, %v3782_v6  ;;  %v1598_v63 = vld [vmem:[%s3490_s4 + $0x28] sm:$0xff] }
 0x4e4   :  { %v1594_v54 = vld [vmem:[%s3490_s4 + $0x8] sm:$0xff] }
 0x4e5   :  { %v1666_v26 = vmul.f32 -1.442695, %v1375_v51 }
 0x4e6   :  { %v1768_v39 = vpop.eup %1767 }
 0x4e7   :  { %v1770_v53 = vpop.eup %1769  ;;  %v1379_v48 = vadd.f32 1.0, %v1768_v39  ;;  %1771 = vpow2.f32 %v1666_v26  ;;  %v1597_v39 = vld [vmem:[%s3490_s4 + $0x20] sm:$0xff] }
 0x4e8   :  { %v1398_v59 = vadd.f32 1.0, %v1770_v53  ;;  %v1596_v53 = vld [vmem:[%s3490_s4 + $0x18] sm:$0xff] }
 0x4e9   :  { %1773 = vrcp.f32 %v1379_v48  ;;  %v1391_v10 = vand.u32 2147483648, %v1379_v48  ;;  %v1389_v7 = vand.u32 2147483647, %v1379_v48  ;;  %vm1385_vm10 = vweird.f32 %v1379_v48 }
 0x4ea   :  { %1775 = vrcp.f32 %v1398_v59  ;;  %v1410_v2 = vand.u32 2147483648, %v1398_v59  ;;  %v1408_v12 = vand.u32 2147483647, %v1398_v59  ;;  %vm1404_vm11 = vweird.f32 %v1398_v59 }
 0x4eb   :  { %v1392_v23 = vor.u32 1.1754944e-38, %v1391_v10  ;;  %vm1390_vm14 = vcmp.eq.f32.partialorder %v1389_v7, 8.507059e+37 }
 0x4ec   :  { %v1411_v15 = vor.u32 1.1754944e-38, %v1410_v2  ;;  %vm1409_vm15 = vcmp.eq.f32.partialorder %v1408_v12, 8.507059e+37 }
 0x4ed   :  { %v1772_v56 = vpop.eup %1771 }
 0x4ee   :  { %v1418_v58 = vadd.f32 1.0, %v1772_v56  ;;  %v3785_v56 = vld [vmem:[#allocation55_spill] sm:$0xff] }
 0x4ef   :  { %v1774_v27 = vpop.eup %1773 }
 0x4f0   :  { %v1776_v62 = vpop.eup %1775  ;;  %v1381_v60 = vmul.f32 %v1774_v27, %v1379_v48  ;;  %1777 = vrcp.f32 %v1418_v58  ;;  %vm1386_vm8 = vweird.f32 %v1774_v27  ;;  %v1430_v31 = vand.u32 2147483648, %v1418_v58  ;;  %v1595_v48 = vld [vmem:[%s3490_s4 + $0x10] sm:$0xff] }
 0x4f1   :  { %v1400_v3 = vmul.f32 %v1776_v62, %v1398_v59  ;;  %1779 = vtanh.f32 %v1374_v11  ;;  %vm1405_vm9 = vweird.f32 %v1776_v62  ;;  %vm1387_vm12 = vmor %vm1385_vm10, %vm1386_vm8  ;;  %vm1424_vm1 = vweird.f32 %v1418_v58 }
 0x4f2   :  { %v1382_v8 = vsub.f32 1.0, %v1381_v60  ;;  %vm1406_vm13 = vmor %vm1404_vm11, %vm1405_vm9  ;;  %v1428_v32 = vand.u32 2147483647, %v1418_v58  ;;  %v1431_v34 = vor.u32 1.1754944e-38, %v1430_v31 }
 0x4f3   :  { %v1401_v1 = vsub.f32 1.0, %v1400_v3 }
 0x4f4   :  { %v1383_v9 = vmul.f32 %v1774_v27, %v1382_v8  ;;  %vm1429_vm3 = vcmp.eq.f32.partialorder %v1428_v32, 8.507059e+37 }
 0x4f5   :  { %v1402_v20 = vmul.f32 %v1776_v62, %v1401_v1 }
 0x4f6   :  { %v1778_v4 = vpop.eup %1777  ;;  %v1384_v14 = vadd.f32 %v1774_v27, %v1383_v9  ;;  %v3786_v9 = vld [vmem:[#allocation54_spill] sm:$0xff] }
 0x4f7   :  { %v1403_v17 = vadd.f32 %v1776_v62, %v1402_v20  ;;  %v1420_v25 = vmul.f32 %v1778_v4, %v1418_v58  ;;  %v1780_v16 = vpop.eup %1779  ;;  %vm1425_vm0 = vweird.f32 %v1778_v4 }
 0x4f8   :  { %v1388_v18 = vsel %vm1387_vm12, %v1774_v27, %v1384_v14  ;;  %vm1426_vm2 = vmor %vm1424_vm1, %vm1425_vm0  ;;  %v1593_v27 = vld [vmem:[%s3490_s4] sm:$0xff] }
 0x4f9   :  { %v1393_v19 = vsel %vm1390_vm14, %v1392_v23, %v1388_v18  ;;  %v1407_v57 = vsel %vm1406_vm13, %v1776_v62, %v1403_v17  ;;  %v1421_v5 = vsub.f32 1.0, %v1420_v25 }
 0x4fa   :  { %v1412_v61 = vsel %vm1409_vm15, %v1411_v15, %v1407_v57  ;;  %v1435_v21 = vmul.f32 %v1780_v16, %v1393_v19 }
 0x4fb   :  { %v1434_v22 = vmul.f32 %v1412_v61, %v3407_v36  ;;  %v1422_v28 = vmul.f32 %v1778_v4, %v1421_v5  ;;  %v1608_v36 = vld [vmem:[%s3490_s4 + $0x78] sm:$0xff] }
 0x4fc   :  { %1613 = vmatpush.msrb.mxu0 %v1608_v36 }
 0x4fd   :  { %v3415_v29 = vadd.f32 %v1435_v21, %v1434_v22  ;;  %v1423_v30 = vadd.f32 %v1778_v4, %v1422_v28 }
 0x4fe   :  { %1614 = vmatpush.msrb.mxu0 %v1607_v40 }
 0x4ff   :  { %1781 = vtanh.f32 %v3415_v29  ;;  %v1427_v33 = vsel %vm1426_vm2, %v1778_v4, %v1423_v30 }
 0x500   :  { %v1432_v37 = vsel %vm1429_vm3, %v1431_v34, %v1427_v33  ;;  %1615 = vmatpush.msrb.mxu0 %v1606_v41 }
 0x502   :  { %1616 = vmatpush.msrb.mxu0 %v1605_v42 }
 0x504   :  { %1617 = vmatpush.msrb.mxu0 %v1604_v43 }
 0x505   :  { %v1782_v35 = vpop.eup %1781 }
 0x506   :  { %v1438_v38 = vmul.f32 %v1782_v35, %v1432_v37  ;;  %1618 = vmatpush.msrb.mxu0 %v1603_v47 }
 0x508   :  { %1460 = vmatmul.f32.vlgmr.msra.gmra.mxu0 %v1438_v38  ;;  %1480 = vmatmul.f32.vlgmr.msra.gmra.mxu1 %v1438_v38 }
 0x509   :  { %1500 = vmatmul.f32.vlgmr.msra.gmra.mxu2 %v1438_v38  ;;  %1520 = vmatmul.f32.vlgmr.msra.gmra.mxu3 %v1438_v38 }
 0x50a   :  { %1619 = vmatpush.msrb.mxu0 %v1602_v55 }
 0x50c   :  { %1620 = vmatpush.msrb.mxu0 %v1601_v24 }
 0x50e   :  { %1621 = vmatpush.msrb.mxu0 %v1600_v46 }
 0x510   :  { %1622 = vmatpush.msrb.mxu0 %v1599_v13 }
 0x512   :  { %1623 = vmatpush.msrb.mxu0 %v1598_v63 }
 0x514   :  { %1624 = vmatpush.msrb.mxu0 %v1597_v39 }
 0x516   :  { %1625 = vmatpush.msrb.mxu0 %v1596_v53 }
 0x518   :  { %1626 = vmatpush.msrb.mxu0 %v1595_v48 }
 0x51a   :  { %1627 = vmatpush.msrb.mxu0 %v1594_v54 }
 0x51c   :  { %1628 = vmatpush.msrb.mxu0 %v1593_v27 }
 0x585   :  { %v1461_v52 = vpop.f32.mrf.mxu0  ;;  %v1481_v50 = vpop.f32.mrf.mxu1 }
 0x586   :  { %v1524_v49 = vadd.f32 %v1461_v52, %v3783_v0  ;;  %v1525_v44 = vadd.f32 %v1481_v50, %v3784_v45 }
 0x588   :  { %v1667_v51 = vmul.f32 -1.442695, %v1524_v49  ;;  %v1668_v26 = vmul.f32 -1.442695, %v1525_v44 }
 0x58a   :  { %1783 = vpow2.f32 %v1667_v51 }
 0x58b   :  { %1785 = vpow2.f32 %v1668_v26 }
 0x58c   :  { %v1521_v59 = vpop.f32.mrf.mxu3  ;;  %v1501_v8 = vpop.f32.mrf.mxu2 }
 0x58d   :  { %v1527_v58 = vadd.f32 %v1521_v59, %v3785_v56  ;;  %v1526_v7 = vadd.f32 %v1501_v8, %v3786_v9 }
 0x58f   :  { %v1669_v6 = vmul.f32 -1.442695, %v1527_v58 }
 0x590   :  { %v1784_v11 = vpop.eup %1783 }
 0x591   :  { %v1786_v62 = vpop.eup %1785  ;;  %v1531_v60 = vadd.f32 1.0, %v1784_v11  ;;  %1787 = vpow2.f32 %v1669_v6 }
 0x592   :  { %v1550_v3 = vadd.f32 1.0, %v1786_v62 }
 0x593   :  { %1789 = vrcp.f32 %v1531_v60  ;;  %v1543_v17 = vand.u32 2147483648, %v1531_v60  ;;  %v1541_v18 = vand.u32 2147483647, %v1531_v60  ;;  %vm1537_vm6 = vweird.f32 %v1531_v60 }
 0x594   :  { %1791 = vrcp.f32 %v1550_v3  ;;  %v1562_v25 = vand.u32 2147483648, %v1550_v3  ;;  %v1560_v19 = vand.u32 2147483647, %v1550_v3  ;;  %vm1556_vm7 = vweird.f32 %v1550_v3 }
 0x595   :  { %v1544_v61 = vor.u32 1.1754944e-38, %v1543_v17  ;;  %vm1542_vm10 = vcmp.eq.f32.partialorder %v1541_v18, 8.507059e+37 }
 0x596   :  { %v1563_v28 = vor.u32 1.1754944e-38, %v1562_v25  ;;  %vm1561_vm11 = vcmp.eq.f32.partialorder %v1560_v19, 8.507059e+37 }
 0x597   :  { %v1788_v1 = vpop.eup %1787 }
 0x598   :  { %v1570_v10 = vadd.f32 1.0, %v1788_v1 }
 0x599   :  { %v1790_v2 = vpop.eup %1789 }
 0x59a   :  { %v1792_v20 = vpop.eup %1791  ;;  %v1533_v12 = vmul.f32 %v1790_v2, %v1531_v60  ;;  %1793 = vrcp.f32 %v1570_v10  ;;  %vm1538_vm4 = vweird.f32 %v1790_v2  ;;  %v1582_v42 = vand.u32 2147483648, %v1570_v10 }
 0x59b   :  { %v1552_v4 = vmul.f32 %v1792_v20, %v1550_v3  ;;  %1795 = vtanh.f32 %v1526_v7  ;;  %vm1557_vm5 = vweird.f32 %v1792_v20  ;;  %vm1539_vm8 = vmor %vm1537_vm6, %vm1538_vm4  ;;  %vm1576_vm13 = vweird.f32 %v1570_v10 }
 0x59c   :  { %v1534_v14 = vsub.f32 1.0, %v1533_v12  ;;  %vm1558_vm9 = vmor %vm1556_vm7, %vm1557_vm5  ;;  %v1580_v43 = vand.u32 2147483647, %v1570_v10  ;;  %v1583_v55 = vor.u32 1.1754944e-38, %v1582_v42 }
 0x59d   :  { %v1553_v23 = vsub.f32 1.0, %v1552_v4 }
 0x59e   :  { %v1535_v15 = vmul.f32 %v1790_v2, %v1534_v14  ;;  %vm1581_vm15 = vcmp.eq.f32.partialorder %v1580_v43, 8.507059e+37 }
 0x59f   :  { %v1554_v16 = vmul.f32 %v1792_v20, %v1553_v23 }
 0x5a0   :  { %v1794_v57 = vpop.eup %1793  ;;  %v1536_v5 = vadd.f32 %v1790_v2, %v1535_v15 }
 0x5a1   :  { %v1555_v21 = vadd.f32 %v1792_v20, %v1554_v16  ;;  %v1572_v22 = vmul.f32 %v1794_v57, %v1570_v10  ;;  %v1796_v31 = vpop.eup %1795  ;;  %vm1577_vm12 = vweird.f32 %v1794_v57 }
 0x5a2   :  { %v1540_v30 = vsel %vm1539_vm8, %v1790_v2, %v1536_v5  ;;  %vm1578_vm14 = vmor %vm1576_vm13, %vm1577_vm12 }
 0x5a3   :  { %v1545_v32 = vsel %vm1542_vm10, %v1544_v61, %v1540_v30  ;;  %v1559_v33 = vsel %vm1558_vm9, %v1792_v20, %v1555_v21  ;;  %v1573_v34 = vsub.f32 1.0, %v1572_v22 }
 0x5a4   :  { %v1564_v35 = vsel %vm1561_vm11, %v1563_v28, %v1559_v33  ;;  %v1587_v37 = vmul.f32 %v1796_v31, %v1545_v32 }
 0x5a5   :  { %v1586_v38 = vmul.f32 %v1564_v35, %v3415_v29  ;;  %v1574_v36 = vmul.f32 %v1794_v57, %v1573_v34  ;;  %v1670_v29 = vld [vmem:[%s3489_s5] ss:$0 sm:$0xff] }
 0x5a7   :  { %v1588_v40 = vadd.f32 %v1587_v37, %v1586_v38  ;;  %v1575_v41 = vadd.f32 %v1794_v57, %v1574_v36 }
 0x5a9   :  { %1797 = vtanh.f32 %v1588_v40  ;;  %1592 = vst [vmem:[%s3491_s10] sm:$0xff] %v1588_v40  ;;  %v1579_v47 = vsel %vm1578_vm14, %v1794_v57, %v1575_v41 }
 0x5aa   :  { %v1584_v46 = vsel %vm1581_vm15, %v1583_v55, %v1579_v47 }
 0x5af   :  { %v1798_v24 = vpop.eup %1797 }
 0x5b0   :  { %v1590_v13 = vmul.f32 %v1798_v24, %v1584_v46 }
 0x5b2   :  { %1591 = vst [vmem:[%s3492_s9] sm:$0xff] %v1590_v13  ;;  %1629 = vmatmul.f32.vlgmr.msrb.gmra.mxu0 %v1590_v13 }
 0x62f   :  { %v1630_v52 = vpop.f32.mrf.mxu0 }
 0x630   :  { %v1631_v50 = vadd.f32 %v1670_v29, %v1630_v52 }
 0x632   :  { %1633 = vst [vmem:[%s3493_s8] sm:$0xff] %v1631_v50 }

</bundles_post_ra>
